<compile_context>
chip_gen: v5e
topology: v5e:2x2
jax: 0.10.0
libtpu: 0.0.40
codegen_flags: <defaults>
</compile_context>

<pallas_src>
import functools

import jax
import jax.numpy as jnp
from jax.experimental import pallas as pl
from jax.experimental.pallas import tpu as pltpu


# ----------------------------------------------------------------------------
# VMEM budget (generation aware) and tile pickers
# ----------------------------------------------------------------------------
def _pick_vmem_limit():
    try:
        cap = int(pltpu.get_tpu_info().vmem_capacity_bytes)
    except Exception:                     # defensive fallback
        cap = 64 * 1024 * 1024
    # ~75% of physical VMEM, capped at 100 MiB, floored at 32 MiB.
    return max(32 * 1024 * 1024, min((cap * 3) // 4, 100 * 1024 * 1024))


_VMEM_LIMIT = _pick_vmem_limit()


def _pick_k_tile(Kp):
    """Largest K chunk (multiple of 128, <=512) dividing Kp, else full Kp."""
    if Kp % 128 == 0:
        for cand in (512, 384, 256, 128):
            if Kp % cand == 0:
                return cand
    return Kp


def _pick_m_tile(Mp):
    """Lane-dense M tile: largest multiple of 128 (<=512) dividing Mp."""
    for cand in (512, 384, 256, 128):
        if Mp % cand == 0:
            return cand
    # TODO(synk): pad M to a multiple of 128 at production sizes instead of
    # falling back to a full-M block (v7x review item).
    return Mp


# ----------------------------------------------------------------------------
# Pallas kernels
# ----------------------------------------------------------------------------
def _tconv_bn_relu_kernel(p_ref, w_ref, g_ref, b_ref, o_ref,
                          acc_ref, sum_ref, sq_ref, *, eps):
    """Fused ConvTranspose GEMM (one phase x one K chunk per step) + BN + ReLU.

    grid = (phases, K chunks), both 'arbitrary'.  The rows of all phases
    together are exactly the N*OH*OW output pixels, so accumulating channel
    sum / sum-of-squares across every grid step yields the training-mode
    BatchNorm batch statistics.  The scale/shift + ReLU epilogue runs once at
    the last grid step and emits a single lane-aligned bf16 store.
    """
    ph = pl.program_id(0)
    kk = pl.program_id(1)
    last_ph = pl.num_programs(0) - 1
    last_kk = pl.num_programs(1) - 1

    @pl.when(jnp.logical_and(ph == 0, kk == 0))
    def _init_stats():
        sum_ref[...] = jnp.zeros(sum_ref.shape, sum_ref.dtype)
        sq_ref[...] = jnp.zeros(sq_ref.shape, sq_ref.dtype)

    @pl.when(kk == 0)
    def _init_acc():
        acc_ref[ph] = jnp.zeros(acc_ref.shape[1:], acc_ref.dtype)

    # MXU: bf16 (Mp, tk) x (tk, Cout) -> f32, accumulated in VMEM scratch.
    acc_ref[ph] += jnp.dot(p_ref[0], w_ref[0],
                           preferred_element_type=jnp.float32)

    @pl.when(kk == last_kk)
    def _accumulate_stats():
        acc = acc_ref[ph]                                    # (Mp, Cout) f32
        sum_ref[...] += jnp.sum(acc, axis=0, keepdims=True)  # sublane adds
        sq_ref[...] += jnp.sum(acc * acc, axis=0, keepdims=True)

    @pl.when(jnp.logical_and(ph == last_ph, kk == last_kk))
    def _epilogue():
        m = float(acc_ref.shape[0] * acc_ref.shape[1])       # = N*OH*OW
        inv_m = 1.0 / m
        mean = sum_ref[...] * inv_m
        var = jnp.maximum(sq_ref[...] * inv_m - mean * mean, 0.0)
        scale = jax.lax.rsqrt(var + eps) * g_ref[...]        # (1, Cout)
        shift = b_ref[...] - mean * scale                    # (1, Cout)
        y = acc_ref[...] * scale[None] + shift[None]         # (phases, Mp, C)
        o_ref[...] = jnp.maximum(y, 0.0).astype(o_ref.dtype)


def _tconv_tanh_kernel(w_ref, p_ref, o_ref):
    # Transposed GEMM: (Cout, Kp) x (Kp, tm) -> (Cout, tm); M rides the
    # 128-lane axis so the Cout=3 image is stored lane-dense.
    o_ref[0] = jnp.tanh(
        jnp.dot(w_ref[0], p_ref[0], preferred_element_type=jnp.float32)
    ).astype(o_ref.dtype)


# ----------------------------------------------------------------------------
# XLA-side glue: sub-pixel patch builder + one-time weight packing
# ----------------------------------------------------------------------------
def _phase_geometry(k, stride, padding):
    """Per output-phase r: (flipped-kernel tap offset, input index base)."""
    lo = k - 1 - padding
    geom = []
    for r in range(stride):
        off = (lo - r) % stride
        base = (r + off - lo) // stride
        geom.append((off, base))
    return geom


def _subpixel_patches(x_nhwc, k, stride, padding, output_padding,
                      *, transposed=False, out_dtype=jnp.bfloat16):
    """Phase-decomposed im2col for ConvTranspose2d (no dilation zeros).

    Returns (pat, OH, OW) with
        pat: (stride^2, Mp, t*t*Cin)   if not transposed
             (stride^2, t*t*Cin, Mp)   if transposed
    where t = k // stride, Mp = N*(OH//stride)*(OW//stride), phase
    p = r_h*stride + r_w owns output pixels with (oh%s, ow%s) == (r_h, r_w),
    and the per-phase column order (tap_a, tap_b, ci), ci fastest, matches
    _pack_tconv_weight_phases.
    """
    N, H, W, C = x_nhwc.shape
    s = stride
    OH = (H - 1) * s - 2 * padding + k + output_padding
    OW = (W - 1) * s - 2 * padding + k + output_padding
    assert k % s == 0, "sub-pixel path needs kernel_size % stride == 0"
    assert OH % s == 0 and OW % s == 0, "sub-pixel path needs OH,OW % stride == 0"
    assert k - 1 - padding >= 0, "padding >= kernel_size not supported"
    t = k // s
    Hs, Ws = OH // s, OW // s
    Mp = N * Hs * Ws

    geom = _phase_geometry(k, s, padding)
    pad_lo_h = max(0, -min(b for _, b in geom))
    pad_hi_h = max(0, max(b for _, b in geom) + (t - 1) + Hs - 1 - (H - 1))
    pad_lo_w = max(0, -min(b for _, b in geom))
    pad_hi_w = max(0, max(b for _, b in geom) + (t - 1) + Ws - 1 - (W - 1))

    xp = jnp.pad(x_nhwc.astype(out_dtype),
                 ((0, 0), (pad_lo_h, pad_hi_h), (pad_lo_w, pad_hi_w), (0, 0)))

    phases = []
    for rh in range(s):
        _, base_h = geom[rh]
        for rw in range(s):
            _, base_w = geom[rw]
            taps = []
            for a in range(t):
                h0 = a + base_h + pad_lo_h
                for b in range(t):
                    w0 = b + base_w + pad_lo_w
                    taps.append(xp[:, h0:h0 + Hs, w0:w0 + Ws, :])
            if transposed:
                ptap = jnp.stack(taps, axis=0)                 # (tt,N,Hs,Ws,C)
                ptap = jnp.transpose(ptap, (0, 4, 1, 2, 3))    # (tt,C,N,Hs,Ws)
                phases.append(ptap.reshape(t * t * C, Mp))
            else:
                ptap = jnp.stack(taps, axis=3)                 # (N,Hs,Ws,tt,C)
                phases.append(ptap.reshape(Mp, t * t * C))
    return jnp.stack(phases, axis=0), OH, OW


def _pack_tconv_weight_phases(w, k, stride, padding):
    """PyTorch ConvTranspose2d weight (Cin, Cout, k, k) ->
       bf16 (stride^2, (k//stride)^2*Cin, Cout), matching _subpixel_patches."""
    Cin, Cout = int(w.shape[0]), int(w.shape[1])
    s, t = stride, k // stride
    geom = _phase_geometry(k, s, padding)
    wflip = jnp.transpose(w[:, :, ::-1, ::-1], (2, 3, 0, 1))   # (k,k,Cin,Cout)
    phases = []
    for rh in range(s):
        off_h, _ = geom[rh]
        for rw in range(s):
            off_w, _ = geom[rw]
            taps = [wflip[off_h + s * a, off_w + s * b]
                    for a in range(t) for b in range(t)]       # each (Cin,Cout)
            phases.append(jnp.stack(taps, axis=0).reshape(t * t * Cin, Cout))
    return jnp.stack(phases, axis=0).astype(jnp.bfloat16)


# ----------------------------------------------------------------------------
# Fused layer wrappers
# ----------------------------------------------------------------------------
def tconv_bn_relu(x_nhwc, w_phases, gamma, beta, *, k, stride, padding,
                  output_padding, eps=1e-5):
    """ConvTranspose2d(bias=False) + BatchNorm2d(train) + ReLU, one kernel."""
    N = x_nhwc.shape[0]
    s = stride
    nph = s * s
    Cout = w_phases.shape[-1]
    pat, OH, OW = _subpixel_patches(x_nhwc, k, stride, padding, output_padding)
    _, Mp, Kp = pat.shape
    tk = _pick_k_tile(Kp)
    nk = Kp // tk
    Hs, Ws = OH // s, OW // s

    cost = pl.CostEstimate(
        flops=2 * nph * Mp * Kp * Cout,
        transcendentals=0,
        bytes_accessed=int(pat.size) * 2 + int(w_phases.size) * 2
                       + nph * Mp * Cout * 2)

    out = pl.pallas_call(
        functools.partial(_tconv_bn_relu_kernel, eps=eps),
        grid=(nph, nk),
        in_specs=[pl.BlockSpec((1, Mp, tk), lambda p, kc: (p, 0, kc)),
                  pl.BlockSpec((1, tk, Cout), lambda p, kc: (p, kc, 0)),
                  pl.BlockSpec((1, Cout), lambda p, kc: (0, 0)),
                  pl.BlockSpec((1, Cout), lambda p, kc: (0, 0))],
        out_specs=pl.BlockSpec((nph, Mp, Cout), lambda p, kc: (0, 0, 0)),
        out_shape=jax.ShapeDtypeStruct((nph, Mp, Cout), jnp.bfloat16),
        scratch_shapes=[pltpu.VMEM((nph, Mp, Cout), jnp.float32),
                        pltpu.VMEM((1, Cout), jnp.float32),
                        pltpu.VMEM((1, Cout), jnp.float32)],
        compiler_params=pltpu.CompilerParams(
            dimension_semantics=("arbitrary", "arbitrary"),
            vmem_limit_bytes=_VMEM_LIMIT),
        cost_estimate=cost,
    )(pat, w_phases, gamma, beta)

    # Pixel-shuffle the phase-major output back to NHWC for the next layer.
    out = out.reshape(s, s, N, Hs, Ws, Cout)
    out = jnp.transpose(out, (2, 3, 0, 4, 1, 5)).reshape(N, OH, OW, Cout)
    return out


def tconv_tanh_nchw(x_nhwc, wT_phases, *, k, stride, padding, output_padding):
    """Final ConvTranspose2d + Tanh; lane-dense transposed GEMM, M-tiled."""
    N = x_nhwc.shape[0]
    s = stride
    nph = s * s
    Cout = wT_phases.shape[1]
    patT, OH, OW = _subpixel_patches(x_nhwc, k, stride, padding,
                                     output_padding, transposed=True)
    _, Kp, Mp = patT.shape
    tm = _pick_m_tile(Mp)
    Hs, Ws = OH // s, OW // s

    cost = pl.CostEstimate(
        flops=2 * nph * Mp * Kp * Cout,
        transcendentals=nph * Mp * Cout,
        bytes_accessed=int(patT.size) * 2 + int(wT_phases.size) * 2
                       + nph * Cout * Mp * 4)

    out = pl.pallas_call(
        _tconv_tanh_kernel,
        grid=(nph, Mp // tm),
        in_specs=[pl.BlockSpec((1, Cout, Kp), lambda p, j: (p, 0, 0)),
                  pl.BlockSpec((1, Kp, tm), lambda p, j: (p, 0, j))],
        out_specs=pl.BlockSpec((1, Cout, tm), lambda p, j: (p, 0, j)),
        out_shape=jax.ShapeDtypeStruct((nph, Cout, Mp), jnp.float32),
        compiler_params=pltpu.CompilerParams(
            dimension_semantics=("parallel", "parallel"),
            vmem_limit_bytes=_VMEM_LIMIT),
        cost_estimate=cost,
    )(wT_phases, patT)

    # (s, s, Cout, N, Hs, Ws) -> NCHW with oh = s*q + r_h, ow = s*p + r_w.
    out = out.reshape(s, s, Cout, N, Hs, Ws)
    out = jnp.transpose(out, (3, 2, 4, 0, 5, 1)).reshape(N, Cout, OH, OW)
    return out


# ----------------------------------------------------------------------------
# Generator parameters (raw, PyTorch layout) + one-time packing + forward
# ----------------------------------------------------------------------------
def init_generator_params(key, config):
    gfs, gl = config['g_feature_size'], config['g_layers']
    len_z, img_h, img_c = config['len_z'], config['img_h'], config['img_c']
    k = config['g_kernel_size']
    c_latent = gfs * 2 ** (gl - 1)
    latent_hw = int(img_h / 2 ** gl)

    params = {}
    key, sub = jax.random.split(key)
    params['w_latent'] = 0.05 * jax.random.normal(
        sub, (len_z, c_latent, latent_hw, latent_hw), jnp.float32)
    params['bn_latent'] = (jnp.ones((c_latent,), jnp.float32),
                           jnp.zeros((c_latent,), jnp.float32))
    c_in = c_latent
    ws, bns = [], []
    for i in range(gl - 2, -1, -1):
        c_layer = int(gfs * 2 ** i)
        key, sub = jax.random.split(key)
        ws.append(0.05 * jax.random.normal(sub, (c_in, c_layer, k, k), jnp.float32))
        bns.append((jnp.ones((c_layer,), jnp.float32),
                    jnp.zeros((c_layer,), jnp.float32)))
        c_in = c_layer
    key, sub = jax.random.split(key)
    params['ws'], params['bns'] = ws, bns
    params['w_final'] = 0.05 * jax.random.normal(sub, (c_in, img_c, k, k), jnp.float32)
    return params


def pack_generator_params(raw, config):
    """Pre-pack every ConvTranspose weight to phase/matmul layout (off the hot path)."""
    k, s, p = config['g_kernel_size'], config['g_stride'], config['g_input_pad']
    latent_hw = int(config['img_h'] // 2 ** config['g_layers'])
    return {
        'w_latent': _pack_tconv_weight_phases(raw['w_latent'], latent_hw, 1, 0),
        'bn_latent': tuple(a.reshape(1, -1) for a in raw['bn_latent']),
        'ws': [_pack_tconv_weight_phases(w, k, s, p) for w in raw['ws']],
        'bns': [tuple(a.reshape(1, -1) for a in bn) for bn in raw['bns']],
        # (s^2, t*t*Cin, Cout) -> (s^2, Cout, t*t*Cin) for the transposed GEMM.
        'w_final_T': jnp.transpose(
            _pack_tconv_weight_phases(raw['w_final'], k, s, p), (0, 2, 1)),
    }


def generator_forward(params, z, config):
    k, s = config['g_kernel_size'], config['g_stride']
    p, op = config['g_input_pad'], config['g_output_pad']
    latent_hw = int(config['img_h'] // 2 ** config['g_layers'])
    N = z.shape[0]

    # TConvLatent on the 1x1 input (+ fused BNLatent + ReLULatent).
    x = z.reshape(N, 1, 1, config['len_z'])         # NHWC view of (N, len_z, 1, 1)
    g, b = params['bn_latent']
    x = tconv_bn_relu(x, params['w_latent'], g, b,
                      k=latent_hw, stride=1, padding=0, output_padding=0)

    # TConv_i + BN_i + ReLU_i, each a single fused Pallas kernel.
    for w, (g, b) in zip(params['ws'], params['bns']):
        x = tconv_bn_relu(x, w, g, b, k=k, stride=s, padding=p, output_padding=op)

    # F_TConv1 + F_Tanh, lane-dense transposed GEMM, parallel phase/M tiles.
    return tconv_tanh_nchw(x, params['w_final_T'],
                           k=k, stride=s, padding=p, output_padding=op)


# ----------------------------------------------------------------------------
# Pure-JAX reference (f32 HIGHEST, correctness checking only)
# ----------------------------------------------------------------------------
def _ref_conv_transpose(x, w, stride, padding, output_padding):
    k = w.shape[2]
    lo = k - 1 - padding
    hi = k - 1 - padding + output_padding
    return jax.lax.conv_general_dilated(
        x, jnp.transpose(w[:, :, ::-1, ::-1], (1, 0, 2, 3)),
        window_strides=(1, 1), padding=((lo, hi), (lo, hi)),
        lhs_dilation=(stride, stride),
        dimension_numbers=('NCHW', 'OIHW', 'NCHW'),
        precision=jax.lax.Precision.HIGHEST)


def _ref_bn_relu(x, g, b):
    mean = x.mean(axis=(0, 2, 3), keepdims=True)
    var = ((x - mean) ** 2).mean(axis=(0, 2, 3), keepdims=True)
    y = (x - mean) / jnp.sqrt(var + 1e-5) * g[None, :, None, None] + b[None, :, None, None]
    return jnp.maximum(y, 0.0)


def _ref_forward(params, z, config):
    stride, pad, opad = config['g_stride'], config['g_input_pad'], config['g_output_pad']
    x = _ref_conv_transpose(z, params['w_latent'], 1, 0, 0)
    g, b = params['bn_latent']
    x = _ref_bn_relu(x, g, b)
    for w, (g, b) in zip(params['ws'], params['bns']):
        x = _ref_bn_relu(_ref_conv_transpose(x, w, stride, pad, opad), g, b)
    return jnp.tanh(_ref_conv_transpose(x, params['w_final'], stride, pad, opad))


# ----------------------------------------------------------------------------
if __name__ == "__main__":
    config = dict(g_feature_size=8, g_layers=3, len_z=16,
                  img_h=16, img_w=16, img_c=3,
                  g_stride=2, g_kernel_size=4, g_input_pad=1, g_output_pad=0)

    key = jax.random.PRNGKey(0)
    pkey, zkey = jax.random.split(key)
    raw_params = init_generator_params(pkey, config)
    packed_params = pack_generator_params(raw_params, config)

    N = 2
    z = jax.random.normal(zkey, (N, config['len_z'], 1, 1), jnp.float32)

    fwd = jax.jit(lambda p, zz: generator_forward(p, zz, config))
    out = jax.block_until_ready(fwd(packed_params, z))

    assert out.shape == (N, config['img_c'], config['img_h'], config['img_w']), out.shape
    ref = _ref_forward(raw_params, z, config)
    max_err = float(jnp.max(jnp.abs(out - ref)))
    # bf16 MXU feeds + bf16 inter-layer activations -> relaxed tolerance.
    assert max_err < 5e-2, f"max_err={max_err}"

    print("KERNEL_OK")
</pallas_src>

<mosaic_0001>
module attributes {stable_mosaic.version = 11 : i64} {
  func.func @_tconv_bn_relu_kernel(%arg0: i32, %arg1: i32, %arg2: memref<1x8x64xbf16, #tpu.memory_space<vmem>>, %arg3: memref<1x64x32xbf16, #tpu.memory_space<vmem>>, %arg4: memref<1x32xf32, #tpu.memory_space<vmem>>, %arg5: memref<1x32xf32, #tpu.memory_space<vmem>>, %arg6: memref<1x8x32xbf16, #tpu.memory_space<vmem>>, %arg7: memref<1x8x32xf32, #tpu.memory_space<vmem>>, %arg8: memref<1x32xf32, #tpu.memory_space<vmem>>, %arg9: memref<1x32xf32, #tpu.memory_space<vmem>>) attributes {dimension_semantics = [#tpu.dimension_semantics<arbitrary>, #tpu.dimension_semantics<arbitrary>], iteration_bounds = array<i64: 1, 1>, scalar_prefetch = 0 : i64, scratch_operands = 3 : i64, tpu.core_type = #tpu.core_type<tc>, window_params = [{transform_indices = @transform_0, window_bounds = array<i64: 1, 8, 64>}, {transform_indices = @transform_1, window_bounds = array<i64: 1, 64, 32>}, {pipeline_mode = #tpu.pipeline_mode<synchronous>, transform_indices = @transform_2, window_bounds = array<i64: 1, 32>}, {pipeline_mode = #tpu.pipeline_mode<synchronous>, transform_indices = @transform_3, window_bounds = array<i64: 1, 32>}, {pipeline_mode = #tpu.pipeline_mode<synchronous>, transform_indices = @transform_4, window_bounds = array<i64: 1, 8, 32>}]} {
    %c0_i32 = arith.constant 0 : i32
    %0 = arith.cmpi eq, %arg0, %c0_i32 : i32
    %c0_i32_0 = arith.constant 0 : i32
    %1 = arith.cmpi eq, %arg1, %c0_i32_0 : i32
    %2 = arith.andi %0, %1 : i1
    %3 = arith.extui %2 : i1 to i32
    %c0_i32_1 = arith.constant 0 : i32
    %4 = arith.cmpi ne, %3, %c0_i32_1 : i32
    scf.if %4 {
      %cst_18 = arith.constant 0.000000e+00 : f32
      %29 = vector.broadcast %cst_18 : f32 to vector<1x32xf32>
      %c0_19 = arith.constant 0 : index
      %c0_20 = arith.constant 0 : index
      %30 = vector.load %arg8[%c0_19, %c0_20] : memref<1x32xf32, #tpu.memory_space<vmem>>, vector<1x32xf32>
      tpu.vector_store %arg8[%c0_19, %c0_20], %29 {strides = array<i32>} : memref<1x32xf32, #tpu.memory_space<vmem>>, vector<1x32xf32>,
      %cst_21 = arith.constant 0.000000e+00 : f32
      %31 = vector.broadcast %cst_21 : f32 to vector<1x32xf32>
      %c0_22 = arith.constant 0 : index
      %c0_23 = arith.constant 0 : index
      %32 = vector.load %arg9[%c0_22, %c0_23] : memref<1x32xf32, #tpu.memory_space<vmem>>, vector<1x32xf32>
      tpu.vector_store %arg9[%c0_22, %c0_23], %31 {strides = array<i32>} : memref<1x32xf32, #tpu.memory_space<vmem>>, vector<1x32xf32>,
    } else {
    }
    %c0_i32_2 = arith.constant 0 : i32
    %5 = arith.cmpi eq, %arg1, %c0_i32_2 : i32
    %6 = arith.extui %5 : i1 to i32
    %c0_i32_3 = arith.constant 0 : i32
    %7 = arith.cmpi ne, %6, %c0_i32_3 : i32
    scf.if %7 {
      %cst_18 = arith.constant 0.000000e+00 : f32
      %29 = vector.broadcast %cst_18 : f32 to vector<8x32xf32>
      %30 = arith.index_cast %arg0 : i32 to index
      %c0_19 = arith.constant 0 : index
      %c0_20 = arith.constant 0 : index
      %31 = vector.load %arg7[%30, %c0_19, %c0_20] : memref<1x8x32xf32, #tpu.memory_space<vmem>>, vector<1x8x32xf32>
      %32 = vector.shape_cast %31 : vector<1x8x32xf32> to vector<8x32xf32>
      %33 = vector.shape_cast %29 : vector<8x32xf32> to vector<1x8x32xf32>
      tpu.vector_store %arg7[%30, %c0_19, %c0_20], %33 {strides = array<i32>} : memref<1x8x32xf32, #tpu.memory_space<vmem>>, vector<1x8x32xf32>,
    } else {
    }
    %8 = arith.index_cast %arg0 : i32 to index
    %c0 = arith.constant 0 : index
    %c0_4 = arith.constant 0 : index
    %9 = vector.load %arg7[%8, %c0, %c0_4] : memref<1x8x32xf32, #tpu.memory_space<vmem>>, vector<1x8x32xf32>
    %10 = vector.shape_cast %9 : vector<1x8x32xf32> to vector<8x32xf32>
    %c0_5 = arith.constant 0 : index
    %c0_6 = arith.constant 0 : index
    %c0_7 = arith.constant 0 : index
    %11 = vector.load %arg2[%c0_5, %c0_6, %c0_7] : memref<1x8x64xbf16, #tpu.memory_space<vmem>>, vector<1x8x64xbf16>
    %12 = vector.shape_cast %11 : vector<1x8x64xbf16> to vector<8x64xbf16>
    %c0_8 = arith.constant 0 : index
    %c0_9 = arith.constant 0 : index
    %c0_10 = arith.constant 0 : index
    %13 = vector.load %arg3[%c0_8, %c0_9, %c0_10] : memref<1x64x32xbf16, #tpu.memory_space<vmem>>, vector<1x64x32xbf16>
    %14 = vector.shape_cast %13 : vector<1x64x32xbf16> to vector<64x32xbf16>
    %cst = arith.constant dense<0.000000e+00> : vector<8x32xf32>
    %15 = tpu.matmul %12, %14, %cst {dimension_numbers = #tpu.dot_dimension_numbers<[1], [0], [0], [1], [0, 0, 1, 1], [], []>} : vector<8x64xbf16>, vector<64x32xbf16>, vector<8x32xf32> -> vector<8x32xf32>
    %16 = arith.addf %10, %15 : vector<8x32xf32>
    %17 = arith.index_cast %arg0 : i32 to index
    %c0_11 = arith.constant 0 : index
    %c0_12 = arith.constant 0 : index
    %18 = vector.load %arg7[%17, %c0_11, %c0_12] : memref<1x8x32xf32, #tpu.memory_space<vmem>>, vector<1x8x32xf32>
    %19 = vector.shape_cast %18 : vector<1x8x32xf32> to vector<8x32xf32>
    %20 = vector.shape_cast %16 : vector<8x32xf32> to vector<1x8x32xf32>
    tpu.vector_store %arg7[%17, %c0_11, %c0_12], %20 {strides = array<i32>} : memref<1x8x32xf32, #tpu.memory_space<vmem>>, vector<1x8x32xf32>,
    %c0_i32_13 = arith.constant 0 : i32
    %21 = arith.cmpi eq, %arg1, %c0_i32_13 : i32
    %22 = arith.extui %21 : i1 to i32
    %c0_i32_14 = arith.constant 0 : i32
    %23 = arith.cmpi ne, %22, %c0_i32_14 : i32
    scf.if %23 {
      %29 = arith.index_cast %arg0 : i32 to index
      %c0_18 = arith.constant 0 : index
      %c0_19 = arith.constant 0 : index
      %30 = vector.load %arg7[%29, %c0_18, %c0_19] : memref<1x8x32xf32, #tpu.memory_space<vmem>>, vector<1x8x32xf32>
      %31 = vector.shape_cast %30 : vector<1x8x32xf32> to vector<8x32xf32>
      %c0_20 = arith.constant 0 : index
      %c0_21 = arith.constant 0 : index
      %32 = vector.load %arg8[%c0_20, %c0_21] : memref<1x32xf32, #tpu.memory_space<vmem>>, vector<1x32xf32>
      %cst_22 = arith.constant dense<0.000000e+00> : vector<32xf32>
      %33 = vector.multi_reduction <add>, %31, %cst_22 [0] : vector<8x32xf32> to vector<32xf32>
      %34 = vector.shape_cast %33 : vector<32xf32> to vector<1x32xf32>
      %35 = arith.addf %32, %34 : vector<1x32xf32>
      %c0_23 = arith.constant 0 : index
      %c0_24 = arith.constant 0 : index
      %36 = vector.load %arg8[%c0_23, %c0_24] : memref<1x32xf32, #tpu.memory_space<vmem>>, vector<1x32xf32>
      tpu.vector_store %arg8[%c0_23, %c0_24], %35 {strides = array<i32>} : memref<1x32xf32, #tpu.memory_space<vmem>>, vector<1x32xf32>,
      %c0_25 = arith.constant 0 : index
      %c0_26 = arith.constant 0 : index
      %37 = vector.load %arg9[%c0_25, %c0_26] : memref<1x32xf32, #tpu.memory_space<vmem>>, vector<1x32xf32>
      %38 = arith.mulf %31, %31 : vector<8x32xf32>
      %cst_27 = arith.constant dense<0.000000e+00> : vector<32xf32>
      %39 = vector.multi_reduction <add>, %38, %cst_27 [0] : vector<8x32xf32> to vector<32xf32>
      %40 = vector.shape_cast %39 : vector<32xf32> to vector<1x32xf32>
      %41 = arith.addf %37, %40 : vector<1x32xf32>
      %c0_28 = arith.constant 0 : index
      %c0_29 = arith.constant 0 : index
      %42 = vector.load %arg9[%c0_28, %c0_29] : memref<1x32xf32, #tpu.memory_space<vmem>>, vector<1x32xf32>
      tpu.vector_store %arg9[%c0_28, %c0_29], %41 {strides = array<i32>} : memref<1x32xf32, #tpu.memory_space<vmem>>, vector<1x32xf32>,
    } else {
    }
    %c0_i32_15 = arith.constant 0 : i32
    %24 = arith.cmpi eq, %arg0, %c0_i32_15 : i32
    %c0_i32_16 = arith.constant 0 : i32
    %25 = arith.cmpi eq, %arg1, %c0_i32_16 : i32
    %26 = arith.andi %24, %25 : i1
    %27 = arith.extui %26 : i1 to i32
    %c0_i32_17 = arith.constant 0 : i32
    %28 = arith.cmpi ne, %27, %c0_i32_17 : i32
    scf.if %28 {
      %c0_18 = arith.constant 0 : index
      %c0_19 = arith.constant 0 : index
      %29 = vector.load %arg8[%c0_18, %c0_19] : memref<1x32xf32, #tpu.memory_space<vmem>>, vector<1x32xf32>
      %cst_20 = arith.constant 1.250000e-01 : f32
      %30 = vector.broadcast %cst_20 : f32 to vector<1x32xf32>
      %31 = arith.mulf %29, %30 : vector<1x32xf32>
      %c0_21 = arith.constant 0 : index
      %c0_22 = arith.constant 0 : index
      %32 = vector.load %arg9[%c0_21, %c0_22] : memref<1x32xf32, #tpu.memory_space<vmem>>, vector<1x32xf32>
      %cst_23 = arith.constant 1.250000e-01 : f32
      %33 = vector.broadcast %cst_23 : f32 to vector<1x32xf32>
      %34 = arith.mulf %32, %33 : vector<1x32xf32>
      %35 = arith.mulf %31, %31 : vector<1x32xf32>
      %36 = arith.subf %34, %35 : vector<1x32xf32>
      %cst_24 = arith.constant 0.000000e+00 : f32
      %37 = vector.broadcast %cst_24 : f32 to vector<1x32xf32>
      %38 = arith.maximumf %36, %37 : vector<1x32xf32>
      %cst_25 = arith.constant 9.99999974E-6 : f32
      %39 = vector.broadcast %cst_25 : f32 to vector<1x32xf32>
      %40 = arith.addf %38, %39 : vector<1x32xf32>
      %41 = math.rsqrt %40 : vector<1x32xf32>
      %c0_26 = arith.constant 0 : index
      %c0_27 = arith.constant 0 : index
      %42 = vector.load %arg4[%c0_26, %c0_27] : memref<1x32xf32, #tpu.memory_space<vmem>>, vector<1x32xf32>
      %43 = arith.mulf %41, %42 : vector<1x32xf32>
      %c0_28 = arith.constant 0 : index
      %c0_29 = arith.constant 0 : index
      %44 = vector.load %arg5[%c0_28, %c0_29] : memref<1x32xf32, #tpu.memory_space<vmem>>, vector<1x32xf32>
      %45 = arith.mulf %31, %43 : vector<1x32xf32>
      %46 = arith.subf %44, %45 : vector<1x32xf32>
      %c0_30 = arith.constant 0 : index
      %c0_31 = arith.constant 0 : index
      %c0_32 = arith.constant 0 : index
      %47 = vector.load %arg7[%c0_30, %c0_31, %c0_32] : memref<1x8x32xf32, #tpu.memory_space<vmem>>, vector<1x8x32xf32>
      %48 = vector.shape_cast %43 : vector<1x32xf32> to vector<1x1x32xf32>
      %49 = vector.broadcast %48 : vector<1x1x32xf32> to vector<1x8x32xf32>
      %50 = arith.mulf %47, %49 : vector<1x8x32xf32>
      %51 = vector.shape_cast %46 : vector<1x32xf32> to vector<1x1x32xf32>
      %52 = vector.broadcast %51 : vector<1x1x32xf32> to vector<1x8x32xf32>
      %53 = arith.addf %50, %52 : vector<1x8x32xf32>
      %cst_33 = arith.constant 0.000000e+00 : f32
      %54 = vector.broadcast %cst_33 : f32 to vector<1x8x32xf32>
      %55 = arith.maximumf %53, %54 : vector<1x8x32xf32>
      %56 = arith.truncf %55 : vector<1x8x32xf32> to vector<1x8x32xbf16>
      %c0_34 = arith.constant 0 : index
      %c0_35 = arith.constant 0 : index
      %c0_36 = arith.constant 0 : index
      %57 = vector.load %arg6[%c0_34, %c0_35, %c0_36] : memref<1x8x32xbf16, #tpu.memory_space<vmem>>, vector<1x8x32xbf16>
      tpu.vector_store %arg6[%c0_34, %c0_35, %c0_36], %56 {strides = array<i32>} : memref<1x8x32xbf16, #tpu.memory_space<vmem>>, vector<1x8x32xbf16>,
    } else {
    }
    return
  }
  func.func @transform_0(%arg0: i32, %arg1: i32) -> (i32, i32, i32) {
    %c0_i32 = arith.constant 0 : i32
    %c0_i32_0 = arith.constant 0 : i32
    return %arg0, %c0_i32, %arg1 : i32, i32, i32
  }
  func.func @transform_1(%arg0: i32, %arg1: i32) -> (i32, i32, i32) {
    %c0_i32 = arith.constant 0 : i32
    %c0_i32_0 = arith.constant 0 : i32
    return %arg0, %arg1, %c0_i32 : i32, i32, i32
  }
  func.func @transform_2(%arg0: i32, %arg1: i32) -> (i32, i32) {
    %c0_i32 = arith.constant 0 : i32
    %c0_i32_0 = arith.constant 0 : i32
    %c0_i32_1 = arith.constant 0 : i32
    return %c0_i32, %c0_i32_0 : i32, i32
  }
  func.func @transform_3(%arg0: i32, %arg1: i32) -> (i32, i32) {
    %c0_i32 = arith.constant 0 : i32
    %c0_i32_0 = arith.constant 0 : i32
    %c0_i32_1 = arith.constant 0 : i32
    return %c0_i32, %c0_i32_0 : i32, i32
  }
  func.func @transform_4(%arg0: i32, %arg1: i32) -> (i32, i32, i32) {
    %c0_i32 = arith.constant 0 : i32
    %c0_i32_0 = arith.constant 0 : i32
    %c0_i32_1 = arith.constant 0 : i32
    %c0_i32_2 = arith.constant 0 : i32
    return %c0_i32, %c0_i32_0, %c0_i32_1 : i32, i32, i32
  }
}

module attributes {stable_mosaic.version = 11 : i64} {
  func.func @_tconv_bn_relu_kernel(%arg0: i32, %arg1: i32, %arg2: memref<1x8x128xbf16, #tpu.memory_space<vmem>>, %arg3: memref<1x128x16xbf16, #tpu.memory_space<vmem>>, %arg4: memref<1x16xf32, #tpu.memory_space<vmem>>, %arg5: memref<1x16xf32, #tpu.memory_space<vmem>>, %arg6: memref<4x8x16xbf16, #tpu.memory_space<vmem>>, %arg7: memref<4x8x16xf32, #tpu.memory_space<vmem>>, %arg8: memref<1x16xf32, #tpu.memory_space<vmem>>, %arg9: memref<1x16xf32, #tpu.memory_space<vmem>>) attributes {dimension_semantics = [#tpu.dimension_semantics<arbitrary>, #tpu.dimension_semantics<arbitrary>], iteration_bounds = array<i64: 4, 1>, scalar_prefetch = 0 : i64, scratch_operands = 3 : i64, tpu.core_type = #tpu.core_type<tc>, window_params = [{transform_indices = @transform_0, window_bounds = array<i64: 1, 8, 128>}, {transform_indices = @transform_1, window_bounds = array<i64: 1, 128, 16>}, {pipeline_mode = #tpu.pipeline_mode<synchronous>, transform_indices = @transform_2, window_bounds = array<i64: 1, 16>}, {pipeline_mode = #tpu.pipeline_mode<synchronous>, transform_indices = @transform_3, window_bounds = array<i64: 1, 16>}, {pipeline_mode = #tpu.pipeline_mode<synchronous>, transform_indices = @transform_4, window_bounds = array<i64: 4, 8, 16>}]} {
    %c0_i32 = arith.constant 0 : i32
    %0 = arith.cmpi eq, %arg0, %c0_i32 : i32
    %c0_i32_0 = arith.constant 0 : i32
    %1 = arith.cmpi eq, %arg1, %c0_i32_0 : i32
    %2 = arith.andi %0, %1 : i1
    %3 = arith.extui %2 : i1 to i32
    %c0_i32_1 = arith.constant 0 : i32
    %4 = arith.cmpi ne, %3, %c0_i32_1 : i32
    scf.if %4 {
      %cst_17 = arith.constant 0.000000e+00 : f32
      %29 = vector.broadcast %cst_17 : f32 to vector<1x16xf32>
      %c0_18 = arith.constant 0 : index
      %c0_19 = arith.constant 0 : index
      %30 = vector.load %arg8[%c0_18, %c0_19] : memref<1x16xf32, #tpu.memory_space<vmem>>, vector<1x16xf32>
      tpu.vector_store %arg8[%c0_18, %c0_19], %29 {strides = array<i32>} : memref<1x16xf32, #tpu.memory_space<vmem>>, vector<1x16xf32>,
      %cst_20 = arith.constant 0.000000e+00 : f32
      %31 = vector.broadcast %cst_20 : f32 to vector<1x16xf32>
      %c0_21 = arith.constant 0 : index
      %c0_22 = arith.constant 0 : index
      %32 = vector.load %arg9[%c0_21, %c0_22] : memref<1x16xf32, #tpu.memory_space<vmem>>, vector<1x16xf32>
      tpu.vector_store %arg9[%c0_21, %c0_22], %31 {strides = array<i32>} : memref<1x16xf32, #tpu.memory_space<vmem>>, vector<1x16xf32>,
    } else {
    }
    %c0_i32_2 = arith.constant 0 : i32
    %5 = arith.cmpi eq, %arg1, %c0_i32_2 : i32
    %6 = arith.extui %5 : i1 to i32
    %c0_i32_3 = arith.constant 0 : i32
    %7 = arith.cmpi ne, %6, %c0_i32_3 : i32
    scf.if %7 {
      %cst_17 = arith.constant 0.000000e+00 : f32
      %29 = vector.broadcast %cst_17 : f32 to vector<8x16xf32>
      %30 = arith.index_cast %arg0 : i32 to index
      %c0_18 = arith.constant 0 : index
      %c0_19 = arith.constant 0 : index
      %31 = vector.load %arg7[%30, %c0_18, %c0_19] : memref<4x8x16xf32, #tpu.memory_space<vmem>>, vector<1x8x16xf32>
      %32 = vector.shape_cast %31 : vector<1x8x16xf32> to vector<8x16xf32>
      %33 = vector.shape_cast %29 : vector<8x16xf32> to vector<1x8x16xf32>
      tpu.vector_store %arg7[%30, %c0_18, %c0_19], %33 {strides = array<i32>} : memref<4x8x16xf32, #tpu.memory_space<vmem>>, vector<1x8x16xf32>,
    } else {
    }
    %8 = arith.index_cast %arg0 : i32 to index
    %c0 = arith.constant 0 : index
    %c0_4 = arith.constant 0 : index
    %9 = vector.load %arg7[%8, %c0, %c0_4] : memref<4x8x16xf32, #tpu.memory_space<vmem>>, vector<1x8x16xf32>
    %10 = vector.shape_cast %9 : vector<1x8x16xf32> to vector<8x16xf32>
    %c0_5 = arith.constant 0 : index
    %c0_6 = arith.constant 0 : index
    %c0_7 = arith.constant 0 : index
    %11 = vector.load %arg2[%c0_5, %c0_6, %c0_7] : memref<1x8x128xbf16, #tpu.memory_space<vmem>>, vector<1x8x128xbf16>
    %12 = vector.shape_cast %11 : vector<1x8x128xbf16> to vector<8x128xbf16>
    %c0_8 = arith.constant 0 : index
    %c0_9 = arith.constant 0 : index
    %c0_10 = arith.constant 0 : index
    %13 = vector.load %arg3[%c0_8, %c0_9, %c0_10] : memref<1x128x16xbf16, #tpu.memory_space<vmem>>, vector<1x128x16xbf16>
    %14 = vector.shape_cast %13 : vector<1x128x16xbf16> to vector<128x16xbf16>
    %cst = arith.constant dense<0.000000e+00> : vector<8x16xf32>
    %15 = tpu.matmul %12, %14, %cst {dimension_numbers = #tpu.dot_dimension_numbers<[1], [0], [0], [1], [0, 0, 1, 1], [], []>} : vector<8x128xbf16>, vector<128x16xbf16>, vector<8x16xf32> -> vector<8x16xf32>
    %16 = arith.addf %10, %15 : vector<8x16xf32>
    %17 = arith.index_cast %arg0 : i32 to index
    %c0_11 = arith.constant 0 : index
    %c0_12 = arith.constant 0 : index
    %18 = vector.load %arg7[%17, %c0_11, %c0_12] : memref<4x8x16xf32, #tpu.memory_space<vmem>>, vector<1x8x16xf32>
    %19 = vector.shape_cast %18 : vector<1x8x16xf32> to vector<8x16xf32>
    %20 = vector.shape_cast %16 : vector<8x16xf32> to vector<1x8x16xf32>
    tpu.vector_store %arg7[%17, %c0_11, %c0_12], %20 {strides = array<i32>} : memref<4x8x16xf32, #tpu.memory_space<vmem>>, vector<1x8x16xf32>,
    %c0_i32_13 = arith.constant 0 : i32
    %21 = arith.cmpi eq, %arg1, %c0_i32_13 : i32
    %22 = arith.extui %21 : i1 to i32
    %c0_i32_14 = arith.constant 0 : i32
    %23 = arith.cmpi ne, %22, %c0_i32_14 : i32
    scf.if %23 {
      %29 = arith.index_cast %arg0 : i32 to index
      %c0_17 = arith.constant 0 : index
      %c0_18 = arith.constant 0 : index
      %30 = vector.load %arg7[%29, %c0_17, %c0_18] : memref<4x8x16xf32, #tpu.memory_space<vmem>>, vector<1x8x16xf32>
      %31 = vector.shape_cast %30 : vector<1x8x16xf32> to vector<8x16xf32>
      %c0_19 = arith.constant 0 : index
      %c0_20 = arith.constant 0 : index
      %32 = vector.load %arg8[%c0_19, %c0_20] : memref<1x16xf32, #tpu.memory_space<vmem>>, vector<1x16xf32>
      %cst_21 = arith.constant dense<0.000000e+00> : vector<16xf32>
      %33 = vector.multi_reduction <add>, %31, %cst_21 [0] : vector<8x16xf32> to vector<16xf32>
      %34 = vector.shape_cast %33 : vector<16xf32> to vector<1x16xf32>
      %35 = arith.addf %32, %34 : vector<1x16xf32>
      %c0_22 = arith.constant 0 : index
      %c0_23 = arith.constant 0 : index
      %36 = vector.load %arg8[%c0_22, %c0_23] : memref<1x16xf32, #tpu.memory_space<vmem>>, vector<1x16xf32>
      tpu.vector_store %arg8[%c0_22, %c0_23], %35 {strides = array<i32>} : memref<1x16xf32, #tpu.memory_space<vmem>>, vector<1x16xf32>,
      %c0_24 = arith.constant 0 : index
      %c0_25 = arith.constant 0 : index
      %37 = vector.load %arg9[%c0_24, %c0_25] : memref<1x16xf32, #tpu.memory_space<vmem>>, vector<1x16xf32>
      %38 = arith.mulf %31, %31 : vector<8x16xf32>
      %cst_26 = arith.constant dense<0.000000e+00> : vector<16xf32>
      %39 = vector.multi_reduction <add>, %38, %cst_26 [0] : vector<8x16xf32> to vector<16xf32>
      %40 = vector.shape_cast %39 : vector<16xf32> to vector<1x16xf32>
      %41 = arith.addf %37, %40 : vector<1x16xf32>
      %c0_27 = arith.constant 0 : index
      %c0_28 = arith.constant 0 : index
      %42 = vector.load %arg9[%c0_27, %c0_28] : memref<1x16xf32, #tpu.memory_space<vmem>>, vector<1x16xf32>
      tpu.vector_store %arg9[%c0_27, %c0_28], %41 {strides = array<i32>} : memref<1x16xf32, #tpu.memory_space<vmem>>, vector<1x16xf32>,
    } else {
    }
    %c3_i32 = arith.constant 3 : i32
    %24 = arith.cmpi eq, %arg0, %c3_i32 : i32
    %c0_i32_15 = arith.constant 0 : i32
    %25 = arith.cmpi eq, %arg1, %c0_i32_15 : i32
    %26 = arith.andi %24, %25 : i1
    %27 = arith.extui %26 : i1 to i32
    %c0_i32_16 = arith.constant 0 : i32
    %28 = arith.cmpi ne, %27, %c0_i32_16 : i32
    scf.if %28 {
      %c0_17 = arith.constant 0 : index
      %c0_18 = arith.constant 0 : index
      %29 = vector.load %arg8[%c0_17, %c0_18] : memref<1x16xf32, #tpu.memory_space<vmem>>, vector<1x16xf32>
      %cst_19 = arith.constant 3.125000e-02 : f32
      %30 = vector.broadcast %cst_19 : f32 to vector<1x16xf32>
      %31 = arith.mulf %29, %30 : vector<1x16xf32>
      %c0_20 = arith.constant 0 : index
      %c0_21 = arith.constant 0 : index
      %32 = vector.load %arg9[%c0_20, %c0_21] : memref<1x16xf32, #tpu.memory_space<vmem>>, vector<1x16xf32>
      %cst_22 = arith.constant 3.125000e-02 : f32
      %33 = vector.broadcast %cst_22 : f32 to vector<1x16xf32>
      %34 = arith.mulf %32, %33 : vector<1x16xf32>
      %35 = arith.mulf %31, %31 : vector<1x16xf32>
      %36 = arith.subf %34, %35 : vector<1x16xf32>
      %cst_23 = arith.constant 0.000000e+00 : f32
      %37 = vector.broadcast %cst_23 : f32 to vector<1x16xf32>
      %38 = arith.maximumf %36, %37 : vector<1x16xf32>
      %cst_24 = arith.constant 9.99999974E-6 : f32
      %39 = vector.broadcast %cst_24 : f32 to vector<1x16xf32>
      %40 = arith.addf %38, %39 : vector<1x16xf32>
      %41 = math.rsqrt %40 : vector<1x16xf32>
      %c0_25 = arith.constant 0 : index
      %c0_26 = arith.constant 0 : index
      %42 = vector.load %arg4[%c0_25, %c0_26] : memref<1x16xf32, #tpu.memory_space<vmem>>, vector<1x16xf32>
      %43 = arith.mulf %41, %42 : vector<1x16xf32>
      %c0_27 = arith.constant 0 : index
      %c0_28 = arith.constant 0 : index
      %44 = vector.load %arg5[%c0_27, %c0_28] : memref<1x16xf32, #tpu.memory_space<vmem>>, vector<1x16xf32>
      %45 = arith.mulf %31, %43 : vector<1x16xf32>
      %46 = arith.subf %44, %45 : vector<1x16xf32>
      %c0_29 = arith.constant 0 : index
      %c0_30 = arith.constant 0 : index
      %c0_31 = arith.constant 0 : index
      %47 = vector.load %arg7[%c0_29, %c0_30, %c0_31] : memref<4x8x16xf32, #tpu.memory_space<vmem>>, vector<4x8x16xf32>
      %48 = vector.shape_cast %43 : vector<1x16xf32> to vector<1x1x16xf32>
      %49 = vector.broadcast %48 : vector<1x1x16xf32> to vector<4x8x16xf32>
      %50 = arith.mulf %47, %49 : vector<4x8x16xf32>
      %51 = vector.shape_cast %46 : vector<1x16xf32> to vector<1x1x16xf32>
      %52 = vector.broadcast %51 : vector<1x1x16xf32> to vector<4x8x16xf32>
      %53 = arith.addf %50, %52 : vector<4x8x16xf32>
      %cst_32 = arith.constant 0.000000e+00 : f32
      %54 = vector.broadcast %cst_32 : f32 to vector<4x8x16xf32>
      %55 = arith.maximumf %53, %54 : vector<4x8x16xf32>
      %56 = arith.truncf %55 : vector<4x8x16xf32> to vector<4x8x16xbf16>
      %c0_33 = arith.constant 0 : index
      %c0_34 = arith.constant 0 : index
      %c0_35 = arith.constant 0 : index
      %57 = vector.load %arg6[%c0_33, %c0_34, %c0_35] : memref<4x8x16xbf16, #tpu.memory_space<vmem>>, vector<4x8x16xbf16>
      tpu.vector_store %arg6[%c0_33, %c0_34, %c0_35], %56 {strides = array<i32>} : memref<4x8x16xbf16, #tpu.memory_space<vmem>>, vector<4x8x16xbf16>,
    } else {
    }
    return
  }
  func.func @transform_0(%arg0: i32, %arg1: i32) -> (i32, i32, i32) {
    %c0_i32 = arith.constant 0 : i32
    %c0_i32_0 = arith.constant 0 : i32
    return %arg0, %c0_i32, %arg1 : i32, i32, i32
  }
  func.func @transform_1(%arg0: i32, %arg1: i32) -> (i32, i32, i32) {
    %c0_i32 = arith.constant 0 : i32
    %c0_i32_0 = arith.constant 0 : i32
    return %arg0, %arg1, %c0_i32 : i32, i32, i32
  }
  func.func @transform_2(%arg0: i32, %arg1: i32) -> (i32, i32) {
    %c0_i32 = arith.constant 0 : i32
    %c0_i32_0 = arith.constant 0 : i32
    %c0_i32_1 = arith.constant 0 : i32
    return %c0_i32, %c0_i32_0 : i32, i32
  }
  func.func @transform_3(%arg0: i32, %arg1: i32) -> (i32, i32) {
    %c0_i32 = arith.constant 0 : i32
    %c0_i32_0 = arith.constant 0 : i32
    %c0_i32_1 = arith.constant 0 : i32
    return %c0_i32, %c0_i32_0 : i32, i32
  }
  func.func @transform_4(%arg0: i32, %arg1: i32) -> (i32, i32, i32) {
    %c0_i32 = arith.constant 0 : i32
    %c0_i32_0 = arith.constant 0 : i32
    %c0_i32_1 = arith.constant 0 : i32
    %c0_i32_2 = arith.constant 0 : i32
    return %c0_i32, %c0_i32_0, %c0_i32_1 : i32, i32, i32
  }
}

module attributes {stable_mosaic.version = 11 : i64} {
  func.func @_tconv_bn_relu_kernel(%arg0: i32, %arg1: i32, %arg2: memref<1x32x64xbf16, #tpu.memory_space<vmem>>, %arg3: memref<1x64x8xbf16, #tpu.memory_space<vmem>>, %arg4: memref<1x8xf32, #tpu.memory_space<vmem>>, %arg5: memref<1x8xf32, #tpu.memory_space<vmem>>, %arg6: memref<4x32x8xbf16, #tpu.memory_space<vmem>>, %arg7: memref<4x32x8xf32, #tpu.memory_space<vmem>>, %arg8: memref<1x8xf32, #tpu.memory_space<vmem>>, %arg9: memref<1x8xf32, #tpu.memory_space<vmem>>) attributes {dimension_semantics = [#tpu.dimension_semantics<arbitrary>, #tpu.dimension_semantics<arbitrary>], iteration_bounds = array<i64: 4, 1>, scalar_prefetch = 0 : i64, scratch_operands = 3 : i64, tpu.core_type = #tpu.core_type<tc>, window_params = [{transform_indices = @transform_0, window_bounds = array<i64: 1, 32, 64>}, {transform_indices = @transform_1, window_bounds = array<i64: 1, 64, 8>}, {pipeline_mode = #tpu.pipeline_mode<synchronous>, transform_indices = @transform_2, window_bounds = array<i64: 1, 8>}, {pipeline_mode = #tpu.pipeline_mode<synchronous>, transform_indices = @transform_3, window_bounds = array<i64: 1, 8>}, {pipeline_mode = #tpu.pipeline_mode<synchronous>, transform_indices = @transform_4, window_bounds = array<i64: 4, 32, 8>}]} {
    %c0_i32 = arith.constant 0 : i32
    %0 = arith.cmpi eq, %arg0, %c0_i32 : i32
    %c0_i32_0 = arith.constant 0 : i32
    %1 = arith.cmpi eq, %arg1, %c0_i32_0 : i32
    %2 = arith.andi %0, %1 : i1
    %3 = arith.extui %2 : i1 to i32
    %c0_i32_1 = arith.constant 0 : i32
    %4 = arith.cmpi ne, %3, %c0_i32_1 : i32
    scf.if %4 {
      %cst_17 = arith.constant 0.000000e+00 : f32
      %29 = vector.broadcast %cst_17 : f32 to vector<1x8xf32>
      %c0_18 = arith.constant 0 : index
      %c0_19 = arith.constant 0 : index
      %30 = vector.load %arg8[%c0_18, %c0_19] : memref<1x8xf32, #tpu.memory_space<vmem>>, vector<1x8xf32>
      tpu.vector_store %arg8[%c0_18, %c0_19], %29 {strides = array<i32>} : memref<1x8xf32, #tpu.memory_space<vmem>>, vector<1x8xf32>,
      %cst_20 = arith.constant 0.000000e+00 : f32
      %31 = vector.broadcast %cst_20 : f32 to vector<1x8xf32>
      %c0_21 = arith.constant 0 : index
      %c0_22 = arith.constant 0 : index
      %32 = vector.load %arg9[%c0_21, %c0_22] : memref<1x8xf32, #tpu.memory_space<vmem>>, vector<1x8xf32>
      tpu.vector_store %arg9[%c0_21, %c0_22], %31 {strides = array<i32>} : memref<1x8xf32, #tpu.memory_space<vmem>>, vector<1x8xf32>,
    } else {
    }
    %c0_i32_2 = arith.constant 0 : i32
    %5 = arith.cmpi eq, %arg1, %c0_i32_2 : i32
    %6 = arith.extui %5 : i1 to i32
    %c0_i32_3 = arith.constant 0 : i32
    %7 = arith.cmpi ne, %6, %c0_i32_3 : i32
    scf.if %7 {
      %cst_17 = arith.constant 0.000000e+00 : f32
      %29 = vector.broadcast %cst_17 : f32 to vector<32x8xf32>
      %30 = arith.index_cast %arg0 : i32 to index
      %c0_18 = arith.constant 0 : index
      %c0_19 = arith.constant 0 : index
      %31 = vector.load %arg7[%30, %c0_18, %c0_19] : memref<4x32x8xf32, #tpu.memory_space<vmem>>, vector<1x32x8xf32>
      %32 = vector.shape_cast %31 : vector<1x32x8xf32> to vector<32x8xf32>
      %33 = vector.shape_cast %29 : vector<32x8xf32> to vector<1x32x8xf32>
      tpu.vector_store %arg7[%30, %c0_18, %c0_19], %33 {strides = array<i32>} : memref<4x32x8xf32, #tpu.memory_space<vmem>>, vector<1x32x8xf32>,
    } else {
    }
    %8 = arith.index_cast %arg0 : i32 to index
    %c0 = arith.constant 0 : index
    %c0_4 = arith.constant 0 : index
    %9 = vector.load %arg7[%8, %c0, %c0_4] : memref<4x32x8xf32, #tpu.memory_space<vmem>>, vector<1x32x8xf32>
    %10 = vector.shape_cast %9 : vector<1x32x8xf32> to vector<32x8xf32>
    %c0_5 = arith.constant 0 : index
    %c0_6 = arith.constant 0 : index
    %c0_7 = arith.constant 0 : index
    %11 = vector.load %arg2[%c0_5, %c0_6, %c0_7] : memref<1x32x64xbf16, #tpu.memory_space<vmem>>, vector<1x32x64xbf16>
    %12 = vector.shape_cast %11 : vector<1x32x64xbf16> to vector<32x64xbf16>
    %c0_8 = arith.constant 0 : index
    %c0_9 = arith.constant 0 : index
    %c0_10 = arith.constant 0 : index
    %13 = vector.load %arg3[%c0_8, %c0_9, %c0_10] : memref<1x64x8xbf16, #tpu.memory_space<vmem>>, vector<1x64x8xbf16>
    %14 = vector.shape_cast %13 : vector<1x64x8xbf16> to vector<64x8xbf16>
    %cst = arith.constant dense<0.000000e+00> : vector<32x8xf32>
    %15 = tpu.matmul %12, %14, %cst {dimension_numbers = #tpu.dot_dimension_numbers<[1], [0], [0], [1], [0, 0, 1, 1], [], []>} : vector<32x64xbf16>, vector<64x8xbf16>, vector<32x8xf32> -> vector<32x8xf32>
    %16 = arith.addf %10, %15 : vector<32x8xf32>
    %17 = arith.index_cast %arg0 : i32 to index
    %c0_11 = arith.constant 0 : index
    %c0_12 = arith.constant 0 : index
    %18 = vector.load %arg7[%17, %c0_11, %c0_12] : memref<4x32x8xf32, #tpu.memory_space<vmem>>, vector<1x32x8xf32>
    %19 = vector.shape_cast %18 : vector<1x32x8xf32> to vector<32x8xf32>
    %20 = vector.shape_cast %16 : vector<32x8xf32> to vector<1x32x8xf32>
    tpu.vector_store %arg7[%17, %c0_11, %c0_12], %20 {strides = array<i32>} : memref<4x32x8xf32, #tpu.memory_space<vmem>>, vector<1x32x8xf32>,
    %c0_i32_13 = arith.constant 0 : i32
    %21 = arith.cmpi eq, %arg1, %c0_i32_13 : i32
    %22 = arith.extui %21 : i1 to i32
    %c0_i32_14 = arith.constant 0 : i32
    %23 = arith.cmpi ne, %22, %c0_i32_14 : i32
    scf.if %23 {
      %29 = arith.index_cast %arg0 : i32 to index
      %c0_17 = arith.constant 0 : index
      %c0_18 = arith.constant 0 : index
      %30 = vector.load %arg7[%29, %c0_17, %c0_18] : memref<4x32x8xf32, #tpu.memory_space<vmem>>, vector<1x32x8xf32>
      %31 = vector.shape_cast %30 : vector<1x32x8xf32> to vector<32x8xf32>
      %c0_19 = arith.constant 0 : index
      %c0_20 = arith.constant 0 : index
      %32 = vector.load %arg8[%c0_19, %c0_20] : memref<1x8xf32, #tpu.memory_space<vmem>>, vector<1x8xf32>
      %cst_21 = arith.constant dense<0.000000e+00> : vector<8xf32>
      %33 = vector.multi_reduction <add>, %31, %cst_21 [0] : vector<32x8xf32> to vector<8xf32>
      %34 = vector.shape_cast %33 : vector<8xf32> to vector<1x8xf32>
      %35 = arith.addf %32, %34 : vector<1x8xf32>
      %c0_22 = arith.constant 0 : index
      %c0_23 = arith.constant 0 : index
      %36 = vector.load %arg8[%c0_22, %c0_23] : memref<1x8xf32, #tpu.memory_space<vmem>>, vector<1x8xf32>
      tpu.vector_store %arg8[%c0_22, %c0_23], %35 {strides = array<i32>} : memref<1x8xf32, #tpu.memory_space<vmem>>, vector<1x8xf32>,
      %c0_24 = arith.constant 0 : index
      %c0_25 = arith.constant 0 : index
      %37 = vector.load %arg9[%c0_24, %c0_25] : memref<1x8xf32, #tpu.memory_space<vmem>>, vector<1x8xf32>
      %38 = arith.mulf %31, %31 : vector<32x8xf32>
      %cst_26 = arith.constant dense<0.000000e+00> : vector<8xf32>
      %39 = vector.multi_reduction <add>, %38, %cst_26 [0] : vector<32x8xf32> to vector<8xf32>
      %40 = vector.shape_cast %39 : vector<8xf32> to vector<1x8xf32>
      %41 = arith.addf %37, %40 : vector<1x8xf32>
      %c0_27 = arith.constant 0 : index
      %c0_28 = arith.constant 0 : index
      %42 = vector.load %arg9[%c0_27, %c0_28] : memref<1x8xf32, #tpu.memory_space<vmem>>, vector<1x8xf32>
      tpu.vector_store %arg9[%c0_27, %c0_28], %41 {strides = array<i32>} : memref<1x8xf32, #tpu.memory_space<vmem>>, vector<1x8xf32>,
    } else {
    }
    %c3_i32 = arith.constant 3 : i32
    %24 = arith.cmpi eq, %arg0, %c3_i32 : i32
    %c0_i32_15 = arith.constant 0 : i32
    %25 = arith.cmpi eq, %arg1, %c0_i32_15 : i32
    %26 = arith.andi %24, %25 : i1
    %27 = arith.extui %26 : i1 to i32
    %c0_i32_16 = arith.constant 0 : i32
    %28 = arith.cmpi ne, %27, %c0_i32_16 : i32
    scf.if %28 {
      %c0_17 = arith.constant 0 : index
      %c0_18 = arith.constant 0 : index
      %29 = vector.load %arg8[%c0_17, %c0_18] : memref<1x8xf32, #tpu.memory_space<vmem>>, vector<1x8xf32>
      %cst_19 = arith.constant 7.812500e-03 : f32
      %30 = vector.broadcast %cst_19 : f32 to vector<1x8xf32>
      %31 = arith.mulf %29, %30 : vector<1x8xf32>
      %c0_20 = arith.constant 0 : index
      %c0_21 = arith.constant 0 : index
      %32 = vector.load %arg9[%c0_20, %c0_21] : memref<1x8xf32, #tpu.memory_space<vmem>>, vector<1x8xf32>
      %cst_22 = arith.constant 7.812500e-03 : f32
      %33 = vector.broadcast %cst_22 : f32 to vector<1x8xf32>
      %34 = arith.mulf %32, %33 : vector<1x8xf32>
      %35 = arith.mulf %31, %31 : vector<1x8xf32>
      %36 = arith.subf %34, %35 : vector<1x8xf32>
      %cst_23 = arith.constant 0.000000e+00 : f32
      %37 = vector.broadcast %cst_23 : f32 to vector<1x8xf32>
      %38 = arith.maximumf %36, %37 : vector<1x8xf32>
      %cst_24 = arith.constant 9.99999974E-6 : f32
      %39 = vector.broadcast %cst_24 : f32 to vector<1x8xf32>
      %40 = arith.addf %38, %39 : vector<1x8xf32>
      %41 = math.rsqrt %40 : vector<1x8xf32>
      %c0_25 = arith.constant 0 : index
      %c0_26 = arith.constant 0 : index
      %42 = vector.load %arg4[%c0_25, %c0_26] : memref<1x8xf32, #tpu.memory_space<vmem>>, vector<1x8xf32>
      %43 = arith.mulf %41, %42 : vector<1x8xf32>
      %c0_27 = arith.constant 0 : index
      %c0_28 = arith.constant 0 : index
      %44 = vector.load %arg5[%c0_27, %c0_28] : memref<1x8xf32, #tpu.memory_space<vmem>>, vector<1x8xf32>
      %45 = arith.mulf %31, %43 : vector<1x8xf32>
      %46 = arith.subf %44, %45 : vector<1x8xf32>
      %c0_29 = arith.constant 0 : index
      %c0_30 = arith.constant 0 : index
      %c0_31 = arith.constant 0 : index
      %47 = vector.load %arg7[%c0_29, %c0_30, %c0_31] : memref<4x32x8xf32, #tpu.memory_space<vmem>>, vector<4x32x8xf32>
      %48 = vector.shape_cast %43 : vector<1x8xf32> to vector<1x1x8xf32>
      %49 = vector.broadcast %48 : vector<1x1x8xf32> to vector<4x32x8xf32>
      %50 = arith.mulf %47, %49 : vector<4x32x8xf32>
      %51 = vector.shape_cast %46 : vector<1x8xf32> to vector<1x1x8xf32>
      %52 = vector.broadcast %51 : vector<1x1x8xf32> to vector<4x32x8xf32>
      %53 = arith.addf %50, %52 : vector<4x32x8xf32>
      %cst_32 = arith.constant 0.000000e+00 : f32
      %54 = vector.broadcast %cst_32 : f32 to vector<4x32x8xf32>
      %55 = arith.maximumf %53, %54 : vector<4x32x8xf32>
      %56 = arith.truncf %55 : vector<4x32x8xf32> to vector<4x32x8xbf16>
      %c0_33 = arith.constant 0 : index
      %c0_34 = arith.constant 0 : index
      %c0_35 = arith.constant 0 : index
      %57 = vector.load %arg6[%c0_33, %c0_34, %c0_35] : memref<4x32x8xbf16, #tpu.memory_space<vmem>>, vector<4x32x8xbf16>
      tpu.vector_store %arg6[%c0_33, %c0_34, %c0_35], %56 {strides = array<i32>} : memref<4x32x8xbf16, #tpu.memory_space<vmem>>, vector<4x32x8xbf16>,
    } else {
    }
    return
  }
  func.func @transform_0(%arg0: i32, %arg1: i32) -> (i32, i32, i32) {
    %c0_i32 = arith.constant 0 : i32
    %c0_i32_0 = arith.constant 0 : i32
    return %arg0, %c0_i32, %arg1 : i32, i32, i32
  }
  func.func @transform_1(%arg0: i32, %arg1: i32) -> (i32, i32, i32) {
    %c0_i32 = arith.constant 0 : i32
    %c0_i32_0 = arith.constant 0 : i32
    return %arg0, %arg1, %c0_i32 : i32, i32, i32
  }
  func.func @transform_2(%arg0: i32, %arg1: i32) -> (i32, i32) {
    %c0_i32 = arith.constant 0 : i32
    %c0_i32_0 = arith.constant 0 : i32
    %c0_i32_1 = arith.constant 0 : i32
    return %c0_i32, %c0_i32_0 : i32, i32
  }
  func.func @transform_3(%arg0: i32, %arg1: i32) -> (i32, i32) {
    %c0_i32 = arith.constant 0 : i32
    %c0_i32_0 = arith.constant 0 : i32
    %c0_i32_1 = arith.constant 0 : i32
    return %c0_i32, %c0_i32_0 : i32, i32
  }
  func.func @transform_4(%arg0: i32, %arg1: i32) -> (i32, i32, i32) {
    %c0_i32 = arith.constant 0 : i32
    %c0_i32_0 = arith.constant 0 : i32
    %c0_i32_1 = arith.constant 0 : i32
    %c0_i32_2 = arith.constant 0 : i32
    return %c0_i32, %c0_i32_0, %c0_i32_1 : i32, i32, i32
  }
}

module attributes {stable_mosaic.version = 11 : i64} {
  func.func @_tconv_tanh_kernel(%arg0: i32, %arg1: i32, %arg2: memref<1x3x32xbf16, #tpu.memory_space<vmem>>, %arg3: memref<1x32x128xbf16, #tpu.memory_space<vmem>>, %arg4: memref<1x3x128xf32, #tpu.memory_space<vmem>>) attributes {dimension_semantics = [#tpu.dimension_semantics<parallel>, #tpu.dimension_semantics<parallel>], iteration_bounds = array<i64: 4, 1>, scalar_prefetch = 0 : i64, scratch_operands = 0 : i64, tpu.core_type = #tpu.core_type<tc>, window_params = [{transform_indices = @transform_0, window_bounds = array<i64: 1, 3, 32>}, {transform_indices = @transform_1, window_bounds = array<i64: 1, 32, 128>}, {transform_indices = @transform_2, window_bounds = array<i64: 1, 3, 128>}]} {
    %c0 = arith.constant 0 : index
    %c0_0 = arith.constant 0 : index
    %c0_1 = arith.constant 0 : index
    %0 = vector.load %arg2[%c0, %c0_0, %c0_1] : memref<1x3x32xbf16, #tpu.memory_space<vmem>>, vector<1x3x32xbf16>
    %1 = vector.shape_cast %0 : vector<1x3x32xbf16> to vector<3x32xbf16>
    %c0_2 = arith.constant 0 : index
    %c0_3 = arith.constant 0 : index
    %c0_4 = arith.constant 0 : index
    %2 = vector.load %arg3[%c0_2, %c0_3, %c0_4] : memref<1x32x128xbf16, #tpu.memory_space<vmem>>, vector<1x32x128xbf16>
    %3 = vector.shape_cast %2 : vector<1x32x128xbf16> to vector<32x128xbf16>
    %cst = arith.constant dense<0.000000e+00> : vector<3x128xf32>
    %4 = tpu.matmul %1, %3, %cst {dimension_numbers = #tpu.dot_dimension_numbers<[1], [0], [0], [1], [0, 0, 1, 1], [], []>} : vector<3x32xbf16>, vector<32x128xbf16>, vector<3x128xf32> -> vector<3x128xf32>
    %5 = math.tanh %4 : vector<3x128xf32>
    %c0_5 = arith.constant 0 : index
    %c0_6 = arith.constant 0 : index
    %c0_7 = arith.constant 0 : index
    %6 = vector.load %arg4[%c0_5, %c0_6, %c0_7] : memref<1x3x128xf32, #tpu.memory_space<vmem>>, vector<1x3x128xf32>
    %7 = vector.shape_cast %6 : vector<1x3x128xf32> to vector<3x128xf32>
    %8 = vector.shape_cast %5 : vector<3x128xf32> to vector<1x3x128xf32>
    tpu.vector_store %arg4[%c0_5, %c0_6, %c0_7], %8 {strides = array<i32>} : memref<1x3x128xf32, #tpu.memory_space<vmem>>, vector<1x3x128xf32>,
    return
  }
  func.func @transform_0(%arg0: i32, %arg1: i32) -> (i32, i32, i32) {
    %c0_i32 = arith.constant 0 : i32
    %c0_i32_0 = arith.constant 0 : i32
    %c0_i32_1 = arith.constant 0 : i32
    return %arg0, %c0_i32, %c0_i32_0 : i32, i32, i32
  }
  func.func @transform_1(%arg0: i32, %arg1: i32) -> (i32, i32, i32) {
    %c0_i32 = arith.constant 0 : i32
    %c0_i32_0 = arith.constant 0 : i32
    return %arg0, %c0_i32, %arg1 : i32, i32, i32
  }
  func.func @transform_2(%arg0: i32, %arg1: i32) -> (i32, i32, i32) {
    %c0_i32 = arith.constant 0 : i32
    %c0_i32_0 = arith.constant 0 : i32
    return %arg0, %c0_i32, %arg1 : i32, i32, i32
  }
}

</mosaic_0001>

<bundles_post_ra>
// kernel: _lambda_.4
= control target key start
LH: loop header
LB: loop body
LE: loop exit
PB: predicated region body
PF: predicated region fallthrough
CT: control target
= control target key end

     0   :  { %vm24_vm0 = vcmask 253952   ;;  %vm32_vm1 = vcmask 261120   ;;  %v182_v1 = vmov 0.0   ;;  %vm70_vm2 = vcmask 523264   ;;  %s240_s1 = inlined_call_operand.vmem [shape: bf16[1,64,32], index: 1, kind: input, shape index: {}]   ;;  %s241_s0 = inlined_call_operand.vmem [shape: bf16[1,8,64], index: 0, kind: input, shape index: {}]   ;;  %s242_s2 = inlined_call_operand.vmem [shape: f32[1,32], index: 2, kind: input, shape index: {}]   ;;  %s243_s3 = inlined_call_operand.vmem [shape: f32[1,32], index: 3, kind: input, shape index: {}]   ;;  %s244_s4 = inlined_call_operand.vmem [shape: bf16[1,8,32], index: 4, kind: output, shape index: {}]  }
   0x1   :  { %v178_v0 = vld [vmem:[%s240_s1 + $0x18] sm:$0xff]  ;;  %25 = vst.msk [vmem:[#allocation3] sm:$0x1] %vm24_vm0, %v182_v1  ;;  %v177_v2 = vld [vmem:[%s240_s1 + $0x10] sm:$0xff]  ;;  %v176_v3 = vld [vmem:[%s240_s1 + $0x8] sm:$0xff]  ;;  %vm152_vm6 = vcmask 257024  }
   0x2   :  { %26 = vst.msk [vmem:[#allocation4] sm:$0x1] %vm24_vm0, %v182_v1  ;;  %78 = vmatpush.bf16.msra.mxu0 %v178_v0  ;;  %v175_v4 = vld [vmem:[%s240_s1] sm:$0xff] }
   0x3   :  { %33 = vst.msk [vmem:[#allocation2] sm:$0xff] %vm32_vm1, %v182_v1  ;;  %v37_v5 = vld [vmem:[%s241_s0] sm:$0xf] }
   0x4   :  { %v136_v44 = vld [vmem:[%s242_s2] sm:$0x1] }
   0x5   :  { %v138_v47 = vld [vmem:[%s243_s3] sm:$0x1] }
   0x6   :  { %79 = vmatpush.bf16.msra.mxu0 %v177_v2 }
   0x8   :  { %v94_v23 = vld [vmem:[#allocation3] sm:$0x1] }
   0x9   :  { %v105_v26 = vld [vmem:[#allocation4] sm:$0x1] }
   0xa   :  { %80 = vmatpush.bf16.msra.mxu0 %v176_v3  ;;  %v36_v6 = vld [vmem:[#allocation2] sm:$0xff] }
   0xe   :  { %81 = vmatpush.bf16.msra.mxu0 %v175_v4 }
  0x11   :  { %174 = vmatmul.msk.bf16.vlgmr.msra.gmra.mxu0 %vm70_vm2, %v37_v5 }
  0x8e   :  { %v83_v7 = vpop.f32.mrf.mxu0 }
  0x8f   :  { %v87_v8 = vadd.f32 %v83_v7, %v36_v6 }
  0x91   :  { %89 = vst.msk [vmem:[#allocation2] sm:$0xff] %vm32_vm1, %v87_v8 }
  0x96   :  { %v85_v9 = vpop.f32.mrf.mxu0 }
  0x98   :  { %v93_v10 = vld [vmem:[#allocation2] sm:$0xff] }
  0x99   :  { %v95_v11 = vsel %vm32_vm1, %v93_v10, 0.0  ;;  %v106_v12 = vmul.f32 %v93_v10, %v93_v10 }
  0x9a   :  { %v96_v13 = vrot.slane %v95_v11, 4 }
  0x9b   :  { %v107_v14 = vsel %vm32_vm1, %v106_v12, 0.0 }
  0x9c   :  { %v97_v15 = vadd.f32 %v96_v13, %v95_v11  ;;  %v108_v16 = vrot.slane %v107_v14, 4 }
  0x9e   :  { %v98_v17 = vrot.slane %v97_v15, 2  ;;  %v109_v18 = vadd.f32 %v108_v16, %v107_v14 }
  0xa0   :  { %v99_v19 = vadd.f32 %v98_v17, %v97_v15  ;;  %v110_v20 = vrot.slane %v109_v18, 2 }
  0xa2   :  { %v100_v21 = vrot.slane %v99_v19, 1  ;;  %v111_v22 = vadd.f32 %v110_v20, %v109_v18 }
  0xa4   :  { %v101_v24 = vadd.f32 %v100_v21, %v99_v19  ;;  %v112_v25 = vrot.slane %v111_v22, 1 }
  0xa6   :  { %v102_v27 = vadd.f32 %v101_v24, %v94_v23  ;;  %v113_v28 = vadd.f32 %v112_v25, %v111_v22 }
  0xa8   :  { %104 = vst.msk [vmem:[#allocation3] sm:$0x1] %vm24_vm0, %v102_v27  ;;  %v114_v29 = vadd.f32 %v113_v28, %v105_v26 }
  0xaa   :  { %115 = vst.msk [vmem:[#allocation4] sm:$0x1] %vm24_vm0, %v114_v29 }
  0xaf   :  { %v118_v30 = vld [vmem:[#allocation3] sm:$0x1] }
  0xb0   :  { %v119_v31 = vmul.f32 0.125, %v118_v30 }
  0xb1   :  { %v120_v32 = vld [vmem:[#allocation4] sm:$0x1] }
  0xb2   :  { %v121_v33 = vmul.f32 0.125, %v120_v32  ;;  %v122_v34 = vmul.f32 %v119_v31, %v119_v31 }
  0xb4   :  { %v123_v35 = vsub.f32 %v121_v33, %v122_v34 }
  0xb6   :  { %v124_v36 = vmax.f32 %v123_v35, 0.0 }
  0xb8   :  { %v125_v37 = vadd.f32 1e-05, %v124_v36 }
  0xba   :  { %180 = vrsqrt.f32 %v125_v37  ;;  %vm132_vm4 = vweird.f32 %v125_v37 }
  0xc0   :  { %v181_v38 = vpop.eup %180 }
  0xc1   :  { %v127_v39 = vmul.f32 %v181_v38, %v125_v37  ;;  %vm133_vm3 = vweird.f32 %v181_v38 }
  0xc2   :  { %vm134_vm5 = vmor %vm132_vm4, %vm133_vm3 }
  0xc3   :  { %v128_v40 = vmul.f32 %v181_v38, %v127_v39 }
  0xc5   :  { %v129_v41 = vmul.f32 0.5, %v128_v40 }
  0xc7   :  { %v130_v42 = vsub.f32 1.5, %v129_v41 }
  0xc9   :  { %v131_v43 = vmul.f32 %v181_v38, %v130_v42 }
  0xcb   :  { %v135_v45 = vsel %vm134_vm5, %v181_v38, %v131_v43 }
  0xcc   :  { %v137_v46 = vmul.f32 %v136_v44, %v135_v45 }
  0xce   :  { %v139_v48 = vmul.f32 %v137_v46, %v119_v31  ;;  %v143_v49 = vperm.slane %v137_v46, 0 }
  0xd0   :  { %v140_v50 = vsub.f32 %v138_v47, %v139_v48  ;;  %v145_v51 = vmul.f32 %v143_v49, %v93_v10 }
  0xd2   :  { %v147_v52 = vperm.slane %v140_v50, 0 }
  0xd4   :  { %v149_v53 = vadd.f32 %v147_v52, %v145_v51 }
  0xd6   :  { %v150_v54 = vmax.f32 %v149_v53, 0.0 }
  0xd8   :  { %v151_v55 = vpack.c.bf16 %v150_v54, %v150_v54 }
  0xda   :  { %153 = vst.msk [vmem:[%s244_s4] sm:$0xf] %vm152_vm6, %v151_v55 }

// kernel: _lambda_.5
= control target key start
LH: loop header
LB: loop body
LE: loop exit
PB: predicated region body
PF: predicated region fallthrough
CT: control target
= control target key end

     0   :  { %s620_s15 = smov 0   ;;  %s622_s16 = smov 0   ;;  %s684_s0 = inlined_call_operand.vmem [shape: bf16[4,8,128], index: 0, kind: input, shape index: {}]   ;;  %s685_s1 = inlined_call_operand.vmem [shape: bf16[4,128,16], index: 1, kind: input, shape index: {}]   ;;  %s686_s2 = inlined_call_operand.vmem [shape: f32[1,16], index: 2, kind: input, shape index: {}]   ;;  %s687_s3 = inlined_call_operand.vmem [shape: f32[1,16], index: 3, kind: input, shape index: {}]   ;;  %s688_s4 = inlined_call_operand.vmem [shape: bf16[4,8,16], index: 4, kind: output, shape index: {}]  }
   0x1   :  { %s624_s17 = smov 0  }
   0x2 LB: > { %s26_s18 = sadd.s32 1, %s587_s16  ;;  %p488_p0 = scmp.ge.s32.totalorder %s591_s17, 1  ;;  %s591_s17 = sphi %s624_s17, %s14_s17   ;;  %s587_s16 = sphi %s622_s16, %s690_s16   ;;  %s583_s15 = sphi %s620_s15, %s689_s15  }
   0x3   : > { %p28_p1 = scmp.ge.s32.totalorder %s26_s18, 4  ;;  %p190_p2 = scmp.lt.s32.totalorder %s591_s17, 5 }
   0x5   : > { %s692_s18 = smov (%p28_p1, %s26_s18), 0  ;;  %p191_p3 = pnand %p488_p0, %p190_p2 }
   0x6   : > { %p222_p4 = scmp.lt.s32.totalorder (!%p191_p3), %s583_s15, 3  ;;  %p239_p5 = scmp.eq.s32.totalorder (!%p191_p3), %s583_s15, 0 }
   0x7   : > { %194 = sbr.rel (%p191_p3) target bundleno = 255 (0xff), region = 36 }
   0xc   : > { %s223_s19 = scalar_select %p222_p4, %s583_s15, 3  ;;  %vm245_vm0 = vcmask (%p239_p5), 122880   ;;  %v593_v0 = vmov (%p239_p5), 0.0  }
   0xd   : > { %244 = sbr.rel (!%p239_p5) target bundleno = 18 (0x12), region = 40  ;;  %246 = vst.msk [vmem:[#allocation3] sm:$0x1] (%p239_p5), %vm245_vm0, %v593_v0 }
   0xe   : > { %s489_s20 = sshll.u32 %s223_s19, 2  ;;  %s530_s21 = sshll.u32 %s223_s19, 6  ;;  %247 = vst.msk [vmem:[#allocation4] sm:$0x1] (%p239_p5), %vm245_vm0, %v593_v0 }
   0xf   : > { %s228_s24 = scalar_lea.vmem %s684_s0, %s489_s20  ;;  %s237_s27 = scalar_lea.vmem %s685_s1, %s530_s21 }
  0x12 PF: > { %v539_v1 = vld [vmem:[%s237_s27 + $0x38] sm:$0xff]  ;;  %s493_s28 = sshll.u32 %s583_s15, 3  ;;  %vm253_vm1 = vcmask 130048   ;;  %v538_v2 = vld [vmem:[%s237_s27 + $0x30] sm:$0xff]  ;;  %v594_v3 = vmov 0.0   ;;  %v537_v4 = vld [vmem:[%s237_s27 + $0x28] sm:$0xff] }
  0x13   : > { %323 = vmatpush.bf16.msra.mxu0 %v539_v1  ;;  %s252_s29 = scalar_lea.vmem [#allocation2], %s493_s28  ;;  %v536_v5 = vld [vmem:[%s237_s27 + $0x20] sm:$0xff]  ;;  %v535_v6 = vld [vmem:[%s237_s27 + $0x18] sm:$0xff]  ;;  %v534_v7 = vld [vmem:[%s237_s27 + $0x10] sm:$0xff]  ;;  %p365_p6 = scmp.eq.s32.totalorder %s583_s15, 3  ;;  %vm352_vm2 = vcmask 122880  }
  0x14   : > { %254 = vst.msk [vmem:[%s252_s29] sm:$0xff] %vm253_vm1, %v594_v3  ;;  %v533_v8 = vld [vmem:[%s237_s27 + $0x8] sm:$0xff]  ;;  %v532_v9 = vld [vmem:[%s237_s27] sm:$0xff]  ;;  %vm419_vm6 = vcmask (%p365_p6), 125952  }
  0x15   : > { %v258_v10 = vld [vmem:[%s228_s24] sm:$0xf] }
  0x16   : > { %v343_v28 = vld [vmem:[#allocation3] sm:$0x1]  ;;  %v354_v31 = vld [vmem:[#allocation4] sm:$0x1] }
  0x17   : > { %324 = vmatpush.bf16.msra.mxu0 %v538_v2  ;;  %v388_v49 = vld [vmem:[%s686_s2] sm:$0x1] (%p365_p6) }
  0x18   : > { %v390_v52 = vld [vmem:[%s687_s3] sm:$0x1] (%p365_p6) }
  0x1b   : > { %325 = vmatpush.bf16.msra.mxu0 %v537_v4  ;;  %v257_v11 = vld [vmem:[%s252_s29] sm:$0xff] }
  0x1f   : > { %326 = vmatpush.bf16.msra.mxu0 %v536_v5 }
  0x23   : > { %327 = vmatpush.bf16.msra.mxu0 %v535_v6 }
  0x27   : > { %328 = vmatpush.bf16.msra.mxu0 %v534_v7 }
  0x2b   : > { %329 = vmatpush.bf16.msra.mxu0 %v533_v8 }
  0x2f   : > { %330 = vmatpush.bf16.msra.mxu0 %v532_v9 }
  0x32   : > { %331 = vmatmul.bf16.vlgmr.msra.gmra.mxu0 %v258_v10 }
  0xaf   : > { %v332_v12 = vpop.f32.mrf.mxu0 }
  0xb0   : > { %v336_v13 = vadd.f32 %v332_v12, %v257_v11 }
  0xb2   : > { %338 = vst.msk [vmem:[%s252_s29] sm:$0xff] %vm253_vm1, %v336_v13 }
  0xb7   : > { %v334_v14 = vpop.f32.mrf.mxu0 }
  0xb9   : > { %v342_v15 = vld [vmem:[%s252_s29] sm:$0xff]  ;;  %v394_v54 = vld [vmem:[#allocation2 + $0x8] sm:$0xff] (%p365_p6)  ;;  %v395_v55 = vld [vmem:[#allocation2 + $0x10] sm:$0xff] (%p365_p6) }
  0xba   : > { %v344_v16 = vsel %vm253_vm1, %v342_v15, 0.0  ;;  %v355_v17 = vmul.f32 %v342_v15, %v342_v15  ;;  %v393_v53 = vld [vmem:[#allocation2] sm:$0xff] (%p365_p6)  ;;  %v396_v58 = vld [vmem:[#allocation2 + $0x18] sm:$0xff] (%p365_p6) }
  0xbb   : > { %v345_v18 = vrot.slane %v344_v16, 4 }
  0xbc   : > { %v356_v19 = vsel %vm253_vm1, %v355_v17, 0.0 }
  0xbd   : > { %v346_v20 = vadd.f32 %v345_v18, %v344_v16  ;;  %v357_v21 = vrot.slane %v356_v19, 4 }
  0xbf   : > { %v347_v22 = vrot.slane %v346_v20, 2  ;;  %v358_v23 = vadd.f32 %v357_v21, %v356_v19 }
  0xc1   : > { %v348_v24 = vadd.f32 %v347_v22, %v346_v20  ;;  %v359_v25 = vrot.slane %v358_v23, 2 }
  0xc3   : > { %v349_v26 = vrot.slane %v348_v24, 1  ;;  %v360_v27 = vadd.f32 %v359_v25, %v358_v23 }
  0xc5   : > { %v350_v29 = vadd.f32 %v349_v26, %v348_v24  ;;  %v361_v30 = vrot.slane %v360_v27, 1 }
  0xc7   : > { %v351_v32 = vadd.f32 %v350_v29, %v343_v28  ;;  %v362_v33 = vadd.f32 %v361_v30, %v360_v27  ;;  %369 = sbr.rel (!%p365_p6) target bundleno = 255 (0xff), region = 52 }
  0xc9   : > { %353 = vst.msk [vmem:[#allocation3] sm:$0x1] %vm352_vm2, %v351_v32  ;;  %v363_v34 = vadd.f32 %v362_v33, %v354_v31 }
  0xcb   : > { %364 = vst.msk [vmem:[#allocation4] sm:$0x1] %vm352_vm2, %v363_v34 }
  0xd0   : > { %v370_v35 = vld [vmem:[#allocation3] sm:$0x1] }
  0xd1   : > { %v371_v37 = vmul.f32 0.03125, %v370_v35 }
  0xd2   : > { %v372_v36 = vld [vmem:[#allocation4] sm:$0x1] }
  0xd3   : > { %v373_v38 = vmul.f32 0.03125, %v372_v36  ;;  %v374_v39 = vmul.f32 %v371_v37, %v371_v37 }
  0xd5   : > { %v375_v40 = vsub.f32 %v373_v38, %v374_v39 }
  0xd7   : > { %v376_v41 = vmax.f32 %v375_v40, 0.0 }
  0xd9   : > { %v377_v42 = vadd.f32 1e-05, %v376_v41 }
  0xdb   : > { %567 = vrsqrt.f32 %v377_v42  ;;  %vm384_vm3 = vweird.f32 %v377_v42 }
  0xe1   : > { %v568_v43 = vpop.eup %567 }
  0xe2   : > { %v379_v44 = vmul.f32 %v568_v43, %v377_v42  ;;  %vm385_vm4 = vweird.f32 %v568_v43 }
  0xe3   : > { %vm386_vm5 = vmor %vm384_vm3, %vm385_vm4 }
  0xe4   : > { %v380_v45 = vmul.f32 %v568_v43, %v379_v44 }
  0xe6   : > { %v381_v46 = vmul.f32 0.5, %v380_v45 }
  0xe8   : > { %v382_v47 = vsub.f32 1.5, %v381_v46 }
  0xea   : > { %v383_v48 = vmul.f32 %v568_v43, %v382_v47 }
  0xec   : > { %v387_v50 = vsel %vm386_vm5, %v568_v43, %v383_v48 }
  0xed   : > { %v389_v51 = vmul.f32 %v388_v49, %v387_v50 }
  0xef   : > { %v391_v56 = vmul.f32 %v389_v51, %v371_v37  ;;  %v398_v57 = vperm.slane %v389_v51, 0 }
  0xf1   : > { %v392_v59 = vsub.f32 %v390_v52, %v391_v56  ;;  %v400_v60 = vmul.f32 %v398_v57, %v393_v53  ;;  %v401_v61 = vmul.f32 %v398_v57, %v394_v54  ;;  %v402_v62 = vmul.f32 %v398_v57, %v395_v55 }
  0xf2   : > { %v403_v63 = vmul.f32 %v398_v57, %v396_v58 }
  0xf3   : > { %v405_v0 = vperm.slane %v392_v59, 0 }
  0xf5   : > { %v407_v1 = vadd.f32 %v405_v0, %v400_v60  ;;  %v408_v2 = vadd.f32 %v405_v0, %v401_v61  ;;  %v409_v3 = vadd.f32 %v405_v0, %v402_v62  ;;  %v410_v4 = vadd.f32 %v405_v0, %v403_v63 }
  0xf7   : > { %v411_v5 = vmax.f32 %v407_v1, 0.0  ;;  %v412_v6 = vmax.f32 %v408_v2, 0.0  ;;  %v413_v7 = vmax.f32 %v409_v3, 0.0  ;;  %v414_v8 = vmax.f32 %v410_v4, 0.0 }
  0xf9   : > { %v415_v9 = vpack.c.bf16 %v411_v5, %v411_v5  ;;  %v416_v10 = vpack.c.bf16 %v412_v6, %v412_v6  ;;  %v417_v11 = vpack.c.bf16 %v413_v7, %v413_v7  ;;  %v418_v12 = vpack.c.bf16 %v414_v8, %v414_v8 }
  0xfb   : > { %420 = vst.msk [vmem:[%s688_s4] sm:$0xf] %vm419_vm6, %v415_v9 }
  0xfc   : > { %421 = vst.msk [vmem:[%s688_s4 + $0x4] sm:$0xf] %vm419_vm6, %v416_v10 }
  0xfd   : > { %422 = vst.msk [vmem:[%s688_s4 + $0x8] sm:$0xf] %vm419_vm6, %v417_v11 }
  0xfe   : > { %423 = vst.msk [vmem:[%s688_s4 + $0xc] sm:$0xf] %vm419_vm6, %v418_v12 }
  0xff PF: > { %s14_s17 = sadd.s32 1, %s591_s17   ;;  %s689_s15 = smov %s587_s16 }
 0x100   : > { %p11_p7 = scmp.ge.s32.totalorder %s14_s17, 6   ;;  %s690_s16 = smov %s692_s18 }
 0x102   :  { %13 = sbr.rel (!%p11_p7) target bundleno = 2 (0x2), region = 83 }

// kernel: _lambda_.6
= control target key start
LH: loop header
LB: loop body
LE: loop exit
PB: predicated region body
PF: predicated region fallthrough
CT: control target
= control target key end

     0   :  { %s721_s15 = smov 0   ;;  %s723_s16 = smov 0   ;;  %s867_s0 = inlined_call_operand.vmem [shape: bf16[4,32,64], index: 0, kind: input, shape index: {}]   ;;  %s868_s1 = inlined_call_operand.vmem [shape: bf16[4,64,8], index: 1, kind: input, shape index: {}]   ;;  %s869_s2 = inlined_call_operand.vmem [shape: f32[1,8], index: 2, kind: input, shape index: {}]   ;;  %s870_s3 = inlined_call_operand.vmem [shape: f32[1,8], index: 3, kind: input, shape index: {}]   ;;  %s871_s4 = inlined_call_operand.vmem [shape: bf16[4,32,8], index: 4, kind: output, shape index: {}]  }
   0x1   :  { %s725_s17 = smov 0  }
   0x2 LB: > { %s26_s18 = sadd.s32 1, %s688_s16  ;;  %p591_p0 = scmp.ge.s32.totalorder %s692_s17, 1  ;;  %s692_s17 = sphi %s725_s17, %s14_s17   ;;  %s688_s16 = sphi %s723_s16, %s873_s16   ;;  %s684_s15 = sphi %s721_s15, %s872_s15  }
   0x3   : > { %p28_p1 = scmp.ge.s32.totalorder %s26_s18, 4  ;;  %p191_p2 = scmp.lt.s32.totalorder %s692_s17, 5 }
   0x5   : > { %s875_s18 = smov (%p28_p1, %s26_s18), 0  ;;  %p192_p3 = pnand %p591_p0, %p191_p2 }
   0x6   : > { %p224_p4 = scmp.lt.s32.totalorder (!%p192_p3), %s684_s15, 3  ;;  %p243_p5 = scmp.eq.s32.totalorder (!%p192_p3), %s684_s15, 0 }
   0x7   : > { %195 = sbr.rel (%p192_p3) target bundleno = 265 (0x109), region = 36 }
   0xc   : > { %s225_s19 = scalar_select %p224_p4, %s684_s15, 3  ;;  %vm249_vm0 = vcmask (%p243_p5), 57344   ;;  %v694_v0 = vmov (%p243_p5), 0.0  }
   0xd   : > { %248 = sbr.rel (!%p243_p5) target bundleno = 18 (0x12), region = 40  ;;  %250 = vst.msk [vmem:[#allocation3] sm:$0x1] (%p243_p5), %vm249_vm0, %v694_v0 }
   0xe   : > { %s628_s20 = sshll.u32 %s225_s19, 4  ;;  %s629_s21 = sshll.u32 %s225_s19, 5  ;;  %251 = vst.msk [vmem:[#allocation4] sm:$0x1] (%p243_p5), %vm249_vm0, %v694_v0 }
   0xf   : > { %s231_s24 = scalar_lea.vmem %s867_s0, %s628_s20  ;;  %s240_s27 = scalar_lea.vmem %s868_s1, %s629_s21 }
  0x12 PF: > { %v636_v1 = vld [vmem:[%s240_s27 + $0x18] sm:$0xff]  ;;  %s597_s28 = sshll.u32 %s684_s15, 5  ;;  %vm257_vm1 = vcmask 64512   ;;  %v635_v2 = vld [vmem:[%s240_s27 + $0x10] sm:$0xff]  ;;  %v695_v3 = vmov 0.0   ;;  %v634_v4 = vld [vmem:[%s240_s27 + $0x8] sm:$0xff] }
  0x13   : > { %325 = vmatpush.bf16.msra.mxu0 %v636_v1  ;;  %638 = vmatpush.bf16.msra.mxu1 %v636_v1  ;;  %s751_s29 = scalar_lea.vmem [#allocation2], %s597_s28  ;;  %v633_v5 = vld [vmem:[%s240_s27] sm:$0xff]  ;;  %v632_v7 = vld [vmem:[%s231_s24 + $0x8] sm:$0xff]  ;;  %vm314_vm2 = vcmask 523264   ;;  %p393_p6 = scmp.eq.s32.totalorder %s684_s15, 3  ;;  %vm371_vm3 = vcmask 57344  }
  0x14   : > { %258 = vst.msk [vmem:[%s751_s29] sm:$0xff] %vm257_vm1, %v695_v3  ;;  %v631_v6 = vld [vmem:[%s231_s24] sm:$0xff]  ;;  %vm507_vm7 = vcmask (%p393_p6), 60416  }
  0x15   : > { %259 = vst.msk [vmem:[%s751_s29 + $0x8] sm:$0xff] %vm257_vm1, %v695_v3  ;;  %v356_v51 = vld [vmem:[#allocation3] sm:$0x1]  ;;  %v373_v54 = vld [vmem:[#allocation4] sm:$0x1] }
  0x16   : > { %260 = vst.msk [vmem:[%s751_s29 + $0x10] sm:$0xff] %vm257_vm1, %v695_v3 }
  0x17   : > { %261 = vst.msk [vmem:[%s751_s29 + $0x18] sm:$0xff] %vm257_vm1, %v695_v3  ;;  %326 = vmatpush.bf16.msra.mxu0 %v635_v2  ;;  %639 = vmatpush.bf16.msra.mxu1 %v635_v2 }
  0x1b   : > { %327 = vmatpush.bf16.msra.mxu0 %v634_v4  ;;  %640 = vmatpush.bf16.msra.mxu1 %v634_v4  ;;  %v264_v8 = vld [vmem:[%s751_s29] sm:$0xff] }
  0x1c   : > { %v265_v14 = vld [vmem:[%s751_s29 + $0x8] sm:$0xff] }
  0x1d   : > { %v266_v9 = vld [vmem:[%s751_s29 + $0x10] sm:$0xff] }
  0x1e   : > { %v267_v15 = vld [vmem:[%s751_s29 + $0x18] sm:$0xff] }
  0x1f   : > { %328 = vmatpush.bf16.msra.mxu0 %v633_v5  ;;  %641 = vmatpush.bf16.msra.mxu1 %v633_v5 }
  0x22   : > { %623 = vmatmul.msk.bf16.vlgmr.msra.gmra.mxu0 %vm314_vm2, %v631_v6  ;;  %624 = vmatmul.msk.bf16.vlgmr.msra.gmra.mxu1 %vm314_vm2, %v632_v7 }
  0x9f   : > { %v330_v10 = vpop.f32.mrf.mxu0  ;;  %v335_v11 = vpop.f32.mrf.mxu1 }
  0xa0   : > { %v340_v12 = vadd.f32 %v330_v10, %v264_v8  ;;  %v342_v13 = vadd.f32 %v335_v11, %v266_v9  ;;  %v416_v8 = vld [vmem:[%s869_s2] sm:$0x1] (%p393_p6) }
  0xa1   : > { %v418_v11 = vld [vmem:[%s870_s3] sm:$0x1] (%p393_p6) }
  0xa2   : > { %345 = vst.msk [vmem:[%s751_s29] sm:$0xff] %vm257_vm1, %v340_v12 }
  0xa3   : > { %347 = vst.msk [vmem:[%s751_s29 + $0x10] sm:$0xff] %vm257_vm1, %v342_v13 }
  0xa7   : > { %v332_v16 = vpop.f32.mrf.mxu0  ;;  %v337_v17 = vpop.f32.mrf.mxu1 }
  0xa8   : > { %v341_v18 = vadd.f32 %v332_v16, %v265_v14  ;;  %v343_v19 = vadd.f32 %v337_v17, %v267_v15 }
  0xa9   : > { %v352_v20 = vld [vmem:[%s751_s29] sm:$0xff] }
  0xaa   : > { %346 = vst.msk [vmem:[%s751_s29 + $0x8] sm:$0xff] %vm257_vm1, %v341_v18  ;;  %v354_v21 = vld [vmem:[%s751_s29 + $0x10] sm:$0xff]  ;;  %v374_v22 = vmul.f32 %v352_v20, %v352_v20  ;;  %v357_v24 = vsel %vm257_vm1, %v352_v20, 0.0 }
  0xab   : > { %348 = vst.msk [vmem:[%s751_s29 + $0x18] sm:$0xff] %vm257_vm1, %v343_v19  ;;  %v376_v25 = vmul.f32 %v354_v21, %v354_v21  ;;  %v360_v31 = vsel %vm257_vm1, %v354_v21, 0.0 }
  0xac   : > { %v378_v30 = vsel %vm257_vm1, %v374_v22, 0.0 }
  0xad   : > { %v381_v36 = vsel %vm257_vm1, %v376_v25, 0.0 }
  0xb1   : > { %v353_v23 = vld [vmem:[%s751_s29 + $0x8] sm:$0xff] }
  0xb2   : > { %v358_v26 = vsel %vm257_vm1, %v353_v23, 0.0  ;;  %v375_v27 = vmul.f32 %v353_v23, %v353_v23  ;;  %v355_v28 = vld [vmem:[%s751_s29 + $0x18] sm:$0xff]  ;;  %v421_v12 = vld [vmem:[#allocation2] sm:$0xff] (%p393_p6)  ;;  %v422_v13 = vld [vmem:[#allocation2 + $0x8] sm:$0xff] (%p393_p6) }
  0xb3   : > { %v359_v29 = vadd.f32 %v358_v26, %v357_v24  ;;  %v377_v33 = vmul.f32 %v355_v28, %v355_v28  ;;  %v362_v37 = vsel %vm257_vm1, %v355_v28, 0.0  ;;  %v423_v14 = vld [vmem:[#allocation2 + $0x10] sm:$0xff] (%p393_p6)  ;;  %v424_v15 = vld [vmem:[#allocation2 + $0x18] sm:$0xff] (%p393_p6)  ;;  %v425_v18 = vld [vmem:[#allocation2 + $0x20] sm:$0xff] (%p393_p6) }
  0xb4   : > { %v379_v32 = vsel %vm257_vm1, %v375_v27, 0.0  ;;  %v426_v19 = vld [vmem:[#allocation2 + $0x28] sm:$0xff] (%p393_p6)  ;;  %v427_v20 = vld [vmem:[#allocation2 + $0x30] sm:$0xff] (%p393_p6)  ;;  %v428_v21 = vld [vmem:[#allocation2 + $0x38] sm:$0xff] (%p393_p6) }
  0xb5   : > { %v380_v34 = vadd.f32 %v379_v32, %v378_v30  ;;  %v361_v35 = vadd.f32 %v360_v31, %v359_v29  ;;  %v383_v40 = vsel %vm257_vm1, %v377_v33, 0.0  ;;  %v429_v22 = vld [vmem:[#allocation2 + $0x40] sm:$0xff] (%p393_p6)  ;;  %v430_v27 = vld [vmem:[#allocation2 + $0x48] sm:$0xff] (%p393_p6)  ;;  %v431_v28 = vld [vmem:[#allocation2 + $0x50] sm:$0xff] (%p393_p6) }
  0xb6   : > { %v432_v29 = vld [vmem:[#allocation2 + $0x58] sm:$0xff] (%p393_p6) }
  0xb7   : > { %v363_v38 = vadd.f32 %v362_v37, %v361_v35  ;;  %v382_v39 = vadd.f32 %v381_v36, %v380_v34 }
  0xb9   : > { %v364_v41 = vrot.slane %v363_v38, 4  ;;  %v384_v42 = vadd.f32 %v383_v40, %v382_v39 }
  0xbb   : > { %v365_v43 = vadd.f32 %v364_v41, %v363_v38  ;;  %v385_v44 = vrot.slane %v384_v42, 4 }
  0xbd   : > { %v366_v45 = vrot.slane %v365_v43, 2  ;;  %v386_v46 = vadd.f32 %v385_v44, %v384_v42  ;;  %v433_v44 = vld [vmem:[#allocation2 + $0x60] sm:$0xff] (%p393_p6) }
  0xbf   : > { %v367_v47 = vadd.f32 %v366_v45, %v365_v43  ;;  %v387_v48 = vrot.slane %v386_v46, 2  ;;  %v434_v45 = vld [vmem:[#allocation2 + $0x68] sm:$0xff] (%p393_p6) }
  0xc1   : > { %v368_v49 = vrot.slane %v367_v47, 1  ;;  %v388_v50 = vadd.f32 %v387_v48, %v386_v46 }
  0xc3   : > { %v369_v52 = vadd.f32 %v368_v49, %v367_v47  ;;  %v389_v53 = vrot.slane %v388_v50, 1 }
  0xc5   : > { %v370_v55 = vadd.f32 %v369_v52, %v356_v51  ;;  %v390_v56 = vadd.f32 %v389_v53, %v388_v50  ;;  %397 = sbr.rel (!%p393_p6) target bundleno = 265 (0x109), region = 52 }
  0xc7   : > { %372 = vst.msk [vmem:[#allocation3] sm:$0x1] %vm371_vm3, %v370_v55  ;;  %v391_v57 = vadd.f32 %v390_v56, %v373_v54 }
  0xc9   : > { %392 = vst.msk [vmem:[#allocation4] sm:$0x1] %vm371_vm3, %v391_v57 }
  0xce   : > { %v398_v58 = vld [vmem:[#allocation3] sm:$0x1] }
  0xcf   : > { %v399_v60 = vmul.f32 0.0078125, %v398_v58 }
  0xd0   : > { %v400_v59 = vld [vmem:[#allocation4] sm:$0x1] }
  0xd1   : > { %v401_v61 = vmul.f32 0.0078125, %v400_v59  ;;  %v402_v62 = vmul.f32 %v399_v60, %v399_v60 }
  0xd3   : > { %v403_v63 = vsub.f32 %v401_v61, %v402_v62  ;;  %v435_v62 = vld [vmem:[#allocation2 + $0x70] sm:$0xff] }
  0xd5   : > { %v404_v0 = vmax.f32 %v403_v63, 0.0  ;;  %v436_v63 = vld [vmem:[#allocation2 + $0x78] sm:$0xff] }
  0xd7   : > { %v405_v1 = vadd.f32 1e-05, %v404_v0 }
  0xd9   : > { %668 = vrsqrt.f32 %v405_v1  ;;  %vm412_vm4 = vweird.f32 %v405_v1 }
  0xdf   : > { %v669_v2 = vpop.eup %668 }
  0xe0   : > { %v407_v3 = vmul.f32 %v669_v2, %v405_v1  ;;  %vm413_vm5 = vweird.f32 %v669_v2 }
  0xe1   : > { %vm414_vm6 = vmor %vm412_vm4, %vm413_vm5 }
  0xe2   : > { %v408_v4 = vmul.f32 %v669_v2, %v407_v3 }
  0xe4   : > { %v409_v5 = vmul.f32 0.5, %v408_v4 }
  0xe6   : > { %v410_v6 = vsub.f32 1.5, %v409_v5 }
  0xe8   : > { %v411_v7 = vmul.f32 %v669_v2, %v410_v6 }
  0xea   : > { %v415_v9 = vsel %vm414_vm6, %v669_v2, %v411_v7 }
  0xeb   : > { %v417_v10 = vmul.f32 %v416_v8, %v415_v9 }
  0xed   : > { %v419_v16 = vmul.f32 %v417_v10, %v399_v60  ;;  %v438_v17 = vperm.slane %v417_v10, 0 }
  0xef   : > { %v420_v23 = vsub.f32 %v418_v11, %v419_v16  ;;  %v440_v24 = vmul.f32 %v438_v17, %v421_v12  ;;  %v441_v25 = vmul.f32 %v438_v17, %v422_v13  ;;  %v442_v26 = vmul.f32 %v438_v17, %v423_v14 }
  0xf0   : > { %v443_v30 = vmul.f32 %v438_v17, %v424_v15  ;;  %v444_v31 = vmul.f32 %v438_v17, %v425_v18  ;;  %v445_v32 = vmul.f32 %v438_v17, %v426_v19  ;;  %v446_v33 = vmul.f32 %v438_v17, %v427_v20 }
  0xf1   : > { %v457_v34 = vperm.slane %v420_v23, 0  ;;  %v447_v35 = vmul.f32 %v438_v17, %v428_v21  ;;  %v448_v36 = vmul.f32 %v438_v17, %v429_v22  ;;  %v449_v37 = vmul.f32 %v438_v17, %v430_v27 }
  0xf2   : > { %v450_v38 = vmul.f32 %v438_v17, %v431_v28  ;;  %v451_v39 = vmul.f32 %v438_v17, %v432_v29  ;;  %v452_v56 = vmul.f32 %v438_v17, %v433_v44  ;;  %v453_v57 = vmul.f32 %v438_v17, %v434_v45 }
  0xf3   : > { %v459_v40 = vadd.f32 %v457_v34, %v440_v24  ;;  %v460_v41 = vadd.f32 %v457_v34, %v441_v25  ;;  %v461_v42 = vadd.f32 %v457_v34, %v442_v26  ;;  %v462_v43 = vadd.f32 %v457_v34, %v443_v30 }
  0xf4   : > { %v463_v46 = vadd.f32 %v457_v34, %v444_v31  ;;  %v464_v47 = vadd.f32 %v457_v34, %v445_v32  ;;  %v465_v48 = vadd.f32 %v457_v34, %v446_v33  ;;  %v466_v49 = vadd.f32 %v457_v34, %v447_v35 }
  0xf5   : > { %v475_v50 = vmax.f32 %v459_v40, 0.0  ;;  %v476_v51 = vmax.f32 %v460_v41, 0.0  ;;  %v477_v52 = vmax.f32 %v461_v42, 0.0  ;;  %v478_v53 = vmax.f32 %v462_v43, 0.0 }
  0xf6   : > { %v479_v54 = vmax.f32 %v463_v46, 0.0  ;;  %v480_v55 = vmax.f32 %v464_v47, 0.0  ;;  %v481_v61 = vmax.f32 %v465_v48, 0.0  ;;  %v482_v3 = vmax.f32 %v466_v49, 0.0 }
  0xf7   : > { %v491_v58 = vpack.c.bf16 %v475_v50, %v475_v50  ;;  %v492_v59 = vpack.c.bf16 %v476_v51, %v476_v51  ;;  %v493_v60 = vpack.c.bf16 %v477_v52, %v477_v52  ;;  %v494_v0 = vpack.c.bf16 %v478_v53, %v478_v53 }
  0xf8   : > { %v495_v1 = vpack.c.bf16 %v479_v54, %v479_v54  ;;  %v496_v2 = vpack.c.bf16 %v480_v55, %v480_v55  ;;  %v467_v4 = vadd.f32 %v457_v34, %v448_v36  ;;  %v468_v5 = vadd.f32 %v457_v34, %v449_v37 }
  0xf9   : > { %508 = vst.msk [vmem:[%s871_s4] sm:$0xf] %vm507_vm7, %v491_v58  ;;  %v469_v6 = vadd.f32 %v457_v34, %v450_v38  ;;  %v470_v7 = vadd.f32 %v457_v34, %v451_v39  ;;  %v471_v8 = vadd.f32 %v457_v34, %v452_v56  ;;  %v472_v9 = vadd.f32 %v457_v34, %v453_v57 }
  0xfa   : > { %509 = vst.msk [vmem:[%s871_s4 + $0x4] sm:$0xf] %vm507_vm7, %v492_v59  ;;  %v454_v10 = vmul.f32 %v438_v17, %v435_v62  ;;  %v455_v11 = vmul.f32 %v438_v17, %v436_v63  ;;  %v497_v12 = vpack.c.bf16 %v481_v61, %v481_v61  ;;  %v483_v13 = vmax.f32 %v467_v4, 0.0 }
  0xfb   : > { %510 = vst.msk [vmem:[%s871_s4 + $0x8] sm:$0xf] %vm507_vm7, %v493_v60  ;;  %v484_v14 = vmax.f32 %v468_v5, 0.0  ;;  %v485_v15 = vmax.f32 %v469_v6, 0.0  ;;  %v498_v16 = vpack.c.bf16 %v482_v3, %v482_v3  ;;  %v486_v18 = vmax.f32 %v470_v7, 0.0 }
  0xfc   : > { %511 = vst.msk [vmem:[%s871_s4 + $0xc] sm:$0xf] %vm507_vm7, %v494_v0  ;;  %v473_v19 = vadd.f32 %v457_v34, %v454_v10  ;;  %v474_v20 = vadd.f32 %v457_v34, %v455_v11  ;;  %v499_v17 = vpack.c.bf16 %v483_v13, %v483_v13  ;;  %v487_v21 = vmax.f32 %v471_v8, 0.0 }
  0xfd   : > { %512 = vst.msk [vmem:[%s871_s4 + $0x10] sm:$0xf] %vm507_vm7, %v495_v1  ;;  %v500_v22 = vpack.c.bf16 %v484_v14, %v484_v14  ;;  %v488_v23 = vmax.f32 %v472_v9, 0.0  ;;  %v501_v24 = vpack.c.bf16 %v485_v15, %v485_v15  ;;  %v502_v26 = vpack.c.bf16 %v486_v18, %v486_v18 }
  0xfe   : > { %513 = vst.msk [vmem:[%s871_s4 + $0x14] sm:$0xf] %vm507_vm7, %v496_v2  ;;  %v489_v25 = vmax.f32 %v473_v19, 0.0  ;;  %v490_v27 = vmax.f32 %v474_v20, 0.0  ;;  %v503_v28 = vpack.c.bf16 %v487_v21, %v487_v21 }
  0xff   : > { %514 = vst.msk [vmem:[%s871_s4 + $0x18] sm:$0xf] %vm507_vm7, %v497_v12  ;;  %v504_v29 = vpack.c.bf16 %v488_v23, %v488_v23 }
 0x100   : > { %515 = vst.msk [vmem:[%s871_s4 + $0x1c] sm:$0xf] %vm507_vm7, %v498_v16  ;;  %v505_v30 = vpack.c.bf16 %v489_v25, %v489_v25  ;;  %v506_v31 = vpack.c.bf16 %v490_v27, %v490_v27 }
 0x101   : > { %516 = vst.msk [vmem:[%s871_s4 + $0x20] sm:$0xf] %vm507_vm7, %v499_v17 }
 0x102   : > { %517 = vst.msk [vmem:[%s871_s4 + $0x24] sm:$0xf] %vm507_vm7, %v500_v22 }
 0x103   : > { %518 = vst.msk [vmem:[%s871_s4 + $0x28] sm:$0xf] %vm507_vm7, %v501_v24 }
 0x104   : > { %519 = vst.msk [vmem:[%s871_s4 + $0x2c] sm:$0xf] %vm507_vm7, %v502_v26 }
 0x105   : > { %520 = vst.msk [vmem:[%s871_s4 + $0x30] sm:$0xf] %vm507_vm7, %v503_v28 }
 0x106   : > { %521 = vst.msk [vmem:[%s871_s4 + $0x34] sm:$0xf] %vm507_vm7, %v504_v29 }
 0x107   : > { %522 = vst.msk [vmem:[%s871_s4 + $0x38] sm:$0xf] %vm507_vm7, %v505_v30 }
 0x108   : > { %523 = vst.msk [vmem:[%s871_s4 + $0x3c] sm:$0xf] %vm507_vm7, %v506_v31 }
 0x109 PF: > { %s14_s17 = sadd.s32 1, %s692_s17   ;;  %s872_s15 = smov %s688_s16 }
 0x10a   : > { %p11_p7 = scmp.ge.s32.totalorder %s14_s17, 6   ;;  %s873_s16 = smov %s875_s18 }
 0x10c   :  { %13 = sbr.rel (!%p11_p7) target bundleno = 2 (0x2), region = 83 }

// kernel: _lambda_.7
= control target key start
LH: loop header
LB: loop body
LE: loop exit
PB: predicated region body
PF: predicated region fallthrough
CT: control target
= control target key end

     0   :  { %s404_s9 = smov 0   ;;  %s406_s10 = smov 0   ;;  %s437_s0 = inlined_call_operand.vmem [shape: bf16[4,3,32], index: 0, kind: input, shape index: {}]   ;;  %s438_s1 = inlined_call_operand.vmem [shape: bf16[4,32,128], index: 1, kind: input, shape index: {}]   ;;  %s439_s2 = inlined_call_operand.vmem [shape: f32[4,3,128], index: 2, kind: output, shape index: {}]  }
   0x1   :  { %s408_s11 = smov 0  }
   0x2 LB: > { %s24_s12 = sadd.s32 1, %s383_s10  ;;  %p320_p0 = scmp.ge.s32.totalorder %s387_s11, 1  ;;  %s387_s11 = sphi %s408_s11, %s12_s11   ;;  %s383_s10 = sphi %s406_s10, %s441_s10   ;;  %s379_s9 = sphi %s404_s9, %s440_s9  }
   0x3   : > { %p26_p1 = scmp.ge.s32.totalorder %s24_s12, 4  ;;  %p140_p2 = scmp.lt.s32.totalorder %s387_s11, 5 }
   0x5   : > { %s443_s12 = smov (%p26_p1, %s24_s12), 0  ;;  %p141_p3 = pnand %p320_p0, %p140_p2 }
   0x6   : > { %p171_p4 = scmp.lt.s32.totalorder (!%p141_p3), %s379_s9, 3 }
   0x7   : > { %144 = sbr.rel (%p141_p3) target bundleno = 157 (0x9d), region = 28 }
   0xc   : > { %s445_s9 = smov (!%p171_p4, %s379_s9), 3  ;;  %vm208_vm0 = vcmask 261120  }
   0xd   : > { %s336_s13 = sshll.u32 %s445_s9, 4  ;;  %s321_s17 = sshll.u32 %s445_s9, 1 }
   0xe   : > { %s182_s16 = scalar_lea.vmem %s438_s1, %s336_s13  ;;  %s174_s20 = scalar_lea.vmem %s437_s0, %s321_s17 }
   0xf   : > { %v338_v0 = vld [vmem:[%s182_s16 + $0x8] sm:$0xff]  ;;  %v337_v1 = vld [vmem:[%s182_s16] sm:$0xff]  ;;  %s324_s21 = sshll.u32 %s445_s9, 2 }
  0x10   : > { %218 = vmatpush.bf16.msra.mxu0 %v338_v0  ;;  %v191_v2 = vld [vmem:[%s174_s20] sm:$0x3]  ;;  %s189_s24 = scalar_lea.vmem %s439_s2, %s324_s21 }
  0x14   : > { %219 = vmatpush.bf16.msra.mxu0 %v337_v1 }
  0x17   : > { %333 = vmatmul.msk.bf16.vlgmr.msra.gmra.mxu0 %vm208_vm0, %v191_v2 }
  0x94   : > { %v221_v3 = vpop.f32.mrf.mxu0 }
  0x95   : > { %363 = vtanh.f32 %v221_v3 }
  0x9b   : > { %v364_v4 = vpop.eup %363 }
  0x9c   : > { %226 = vst [vmem:[%s189_s24] sm:$0x7] %v364_v4  ;;  %v223_v5 = vpop.f32.mrf.mxu0 }
  0x9d PF: > { %s12_s11 = sadd.s32 1, %s387_s11   ;;  %s440_s9 = smov %s383_s10 }
  0x9e   : > { %p9_p5 = scmp.ge.s32.totalorder %s12_s11, 6   ;;  %s441_s10 = smov %s443_s12 }
  0xa0   :  { %11 = sbr.rel (!%p9_p5) target bundleno = 2 (0x2), region = 61 }

</bundles_post_ra>
